<compile_context>
chip_gen: v7x
topology: tpu7x:2x2x1
jax: 0.10.0
libtpu: 0.0.40
codegen_flags: <defaults>
</compile_context>

<pallas_src>
import functools

import jax
import jax.numpy as jnp
from jax.experimental import pallas as pl
from jax.experimental.pallas import tpu as pltpu

LN_EPS = 1e-5
LANE = 128
SUB = 8

VMEM_SPEC = pl.BlockSpec(memory_space=pltpu.MemorySpace.VMEM)
SMEM_SPEC = pl.BlockSpec(memory_space=pltpu.MemorySpace.SMEM)


def _elu(x):
    # torch.nn.ELU(alpha=1.0); clamp the exp argument so positive lanes never
    # produce a transient inf before the select.
    return jnp.where(x > 0, x, jnp.exp(jnp.minimum(x, 0.0)) - 1.0)


def _masked_layernorm(h, mask, n_valid, gamma=None, beta=None):
    # LayerNorm over the first n_valid lanes of a lane-padded (rows, Hp) tile.
    inv = 1.0 / float(n_valid)
    mu = jnp.sum(h * mask, axis=-1, keepdims=True) * inv
    diff = (h - mu) * mask
    var = jnp.sum(diff * diff, axis=-1, keepdims=True) * inv
    y = diff * jax.lax.rsqrt(var + LN_EPS)
    if gamma is not None:
        y = y * gamma + beta
    return y


# --------------------------- fused forward kernel ---------------------------
def fused_diffusion_kernel(
    alphas_ref,                                   # SMEM (L,)
    x_ref,                                        # (N, INk)          f32
    wf_ref, bf_ref, g_ref, be_ref,                # first_linear (bf16 W) + LN affine
    w1_ref, b1_ref, w2_ref, b2_ref,               # stacked middle MLP (L,Hp,Hp) bf16
    lblk_ref,                                     # (d*d, N, N)        f32 Laplacian blocks
    sel_ref, plc_ref,                             # (d, Hp, Hp)        f32 lane gather/scatter
    wd1_ref, bd1_ref, wd2_ref, bd2_ref,           # decoder (bf16 W)
    o_ref,                                        # (N, OUTp)          f32
    *, n_layers, d, h_valid, h_pad,
):
    # Loop-invariant lane mask (hoisted once).
    lane = jax.lax.broadcasted_iota(jnp.int32, (1, h_pad), 1)
    mask = (lane < h_valid).astype(jnp.float32)

    # ---- encode: first_linear -> LayerNorm(affine) -> ELU ----
    x = jnp.dot(x_ref[...].astype(jnp.bfloat16), wf_ref[...],
                preferred_element_type=jnp.float32) + bf_ref[...]
    x = _elu(_masked_layernorm(x, mask, h_valid, g_ref[...], be_ref[...]))

    def layer_body(l, x):
        # middle MLP: Lin -> ELU -> Lin, then fresh (weight=1, bias=0) LayerNorm.
        h = _elu(jnp.dot(x.astype(jnp.bfloat16), w1_ref[l],
                         preferred_element_type=jnp.float32) + b1_ref[l])
        dx = jnp.dot(h.astype(jnp.bfloat16), w2_ref[l],
                     preferred_element_type=jnp.float32) + b2_ref[l]
        dx = _masked_layernorm(dx, mask, h_valid)

        # Sheaf diffusion  ldx = (lap @ dx.reshape(N*d, hc)).reshape(N, H), done
        # lane-dense entirely on the MXU:
        #   dxq    = dx @ sel[q]          (lane block q gathered to lanes [0,hc))
        #   acc_p  = sum_q lblk[p,q] @ dxq
        #   ldx   += acc_p @ plc[p]       (lanes [0,hc) scattered to lane block p)
        dxq = [jnp.dot(dx, sel_ref[q], preferred_element_type=jnp.float32)
               for q in range(d)]
        ldx = None
        for p in range(d):
            acc = jnp.dot(lblk_ref[p * d], dxq[0], preferred_element_type=jnp.float32)
            for q in range(1, d):
                acc = acc + jnp.dot(lblk_ref[p * d + q], dxq[q],
                                    preferred_element_type=jnp.float32)
            term = jnp.dot(acc, plc_ref[p], preferred_element_type=jnp.float32)
            ldx = term if ldx is None else ldx + term

        return x - alphas_ref[l] * ldx

    x = jax.lax.fori_loop(0, n_layers, layer_body, x, unroll=(n_layers <= 8))

    # ---- decoder (node_classification): Lin -> ELU -> Lin ----
    h = _elu(jnp.dot(x.astype(jnp.bfloat16), wd1_ref[...],
                     preferred_element_type=jnp.float32) + bd1_ref[...])
    o_ref[...] = jnp.dot(h.astype(jnp.bfloat16), wd2_ref[...],
                         preferred_element_type=jnp.float32) + bd2_ref[...]


# --------------------------------- wrapper ----------------------------------
def _round_up(n, m):
    return ((n + m - 1) // m) * m


def _pad2(a, rows, cols):
    out = jnp.zeros((rows, cols), a.dtype)
    return out.at[: a.shape[0], : a.shape[1]].set(a)


@jax.jit
def diffusion_forward(x, params, lap):
    n, in_dim = x.shape
    h = params["w_first"].shape[1]
    nd = lap.shape[0]
    d = nd // n
    hc = h // d
    n_layers = int(params["alphas"].shape[0])
    out_dim = params["decoder"][2].shape[1]

    in_k = _round_up(in_dim, SUB)      # contraction dims: sublane (8) alignment only
    out_k = _round_up(out_dim, SUB)    # decoder intermediate width / wd2's K dim
    h_p = _round_up(h, LANE)           # hidden lane dim stays 128-dense
    out_p = _round_up(out_dim, LANE)   # final output store stays lane-dense

    to_bf16 = lambda a: a.astype(jnp.bfloat16)

    # Lane/sublane-pad with zeros (plain-JAX glue, fused/constant-folded by XLA).
    x_p = _pad2(x, n, in_k)
    wf = to_bf16(_pad2(params["w_first"], in_k, h_p))
    bf = _pad2(params["b_first"], 1, h_p)
    gam = _pad2(params["ln_gamma"], 1, h_p)
    bet = _pad2(params["ln_beta"], 1, h_p)

    w1 = to_bf16(jnp.stack([_pad2(w, h_p, h_p) for (w, _, _, _) in params["mid"]]))
    b1 = jnp.stack([_pad2(b, 1, h_p) for (_, b, _, _) in params["mid"]])
    w2 = to_bf16(jnp.stack([_pad2(w, h_p, h_p) for (_, _, w, _) in params["mid"]]))
    b2 = jnp.stack([_pad2(b, 1, h_p) for (_, _, _, b) in params["mid"]])

    # (N*d, N*d) Laplacian -> (d*d, N, N) blocks: lblk[p*d+q][i,j] = lap[i*d+p, j*d+q]
    lblk = lap.reshape(n, d, n, d).transpose(1, 3, 0, 2).reshape(d * d, n, n)
    lblk = lblk.astype(jnp.float32)

    # Exact 0/1 lane gather/scatter operators (loop-invariant, built once):
    #   sel[q]: lane block q -> lanes [0, hc);   plc[p] = sel[p].T : lanes [0,hc) -> block p
    eye_hc = jnp.eye(hc, dtype=jnp.float32)
    sel = jnp.zeros((d, h_p, h_p), jnp.float32)
    for q in range(d):
        sel = sel.at[q, q * hc:(q + 1) * hc, 0:hc].set(eye_hc)
    plc = jnp.transpose(sel, (0, 2, 1))

    wd1, bd1, wd2, bd2 = params["decoder"]
    wd1 = to_bf16(_pad2(wd1, h_p, out_k))
    bd1 = _pad2(bd1, 1, out_k)
    wd2 = to_bf16(_pad2(wd2, out_k, out_p))
    bd2 = _pad2(bd2, 1, out_p)

    alphas = params["alphas"].astype(jnp.float32)

    operands = (alphas, x_p, wf, bf, gam, bet, w1, b1, w2, b2,
                lblk, sel, plc, wd1, bd1, wd2, bd2)

    # VMEM budget derived from the actual footprint (4x headroom, clamped to 64 MiB
    # so the same kernel stays inside v7x's physical VMEM).
    in_bytes = sum(int(a.size) * a.dtype.itemsize for a in operands)
    out_bytes = n * out_p * 4
    vmem_bytes = int(min(64 * 1024 * 1024,
                         max(4 * 1024 * 1024, 4 * (in_bytes + out_bytes))))

    kernel = functools.partial(
        fused_diffusion_kernel,
        n_layers=n_layers, d=int(d), h_valid=int(h), h_pad=int(h_p))

    out_padded = pl.pallas_call(
        kernel,
        out_shape=jax.ShapeDtypeStruct((n, out_p), jnp.float32),
        in_specs=[SMEM_SPEC] + [VMEM_SPEC] * 16,
        out_specs=VMEM_SPEC,
        compiler_params=pltpu.CompilerParams(vmem_limit_bytes=vmem_bytes),
    )(*operands)

    return out_padded[:, :out_dim]


# ------------------------------ params / reference --------------------------
def make_params(key, input_dim, hidden_dim, output_dim, n_layers):
    ks = iter(jax.random.split(key, 4 + 4 * n_layers + 4))

    def lin(kw, kb, fan_in, fan_out):
        bound = 1.0 / jnp.sqrt(fan_in)
        w = jax.random.uniform(kw, (fan_in, fan_out), jnp.float32, -bound, bound)
        b = jax.random.uniform(kb, (1, fan_out), jnp.float32, -bound, bound)
        return w, b

    # first_linear: nn.init.uniform_(weight, a=-1, b=1); default bias init
    w_first = jax.random.uniform(next(ks), (input_dim, hidden_dim), jnp.float32, -1.0, 1.0)
    bb = 1.0 / jnp.sqrt(input_dim)
    b_first = jax.random.uniform(next(ks), (1, hidden_dim), jnp.float32, -bb, bb)

    params = {
        "w_first": w_first,
        "b_first": b_first,
        "ln_gamma": jnp.ones((1, hidden_dim), jnp.float32),
        "ln_beta": jnp.zeros((1, hidden_dim), jnp.float32),
        "mid": [],
        "alphas": jnp.full((n_layers,), 0.5, jnp.float32),
    }
    for _ in range(n_layers):
        w1, b1 = lin(next(ks), next(ks), hidden_dim, hidden_dim)
        w2, b2 = lin(next(ks), next(ks), hidden_dim, hidden_dim)
        params["mid"].append((w1, b1, w2, b2))

    wd1, bd1 = lin(next(ks), next(ks), hidden_dim, output_dim)
    wd2, bd2 = lin(next(ks), next(ks), output_dim, output_dim)
    params["decoder"] = (wd1, bd1, wd2, bd2)
    return params


def _reference_forward(x, params, lap):
    # Pure-JAX reference of the module semantics, mirroring the kernel's precision
    # choices (bf16 matmul operands, f32 accumulation, f32 elementwise math) so the
    # tight tolerance check validates the kernel structure apples-to-apples.
    bf16 = lambda a: a.astype(jnp.bfloat16).astype(jnp.float32)

    def dot(a, b):
        return jnp.dot(bf16(a), bf16(b), preferred_element_type=jnp.float32)

    def elu(v):
        return jnp.where(v > 0, v, jnp.exp(jnp.minimum(v, 0.0)) - 1.0)

    def ln(v, g=None, b=None):
        mu = v.mean(-1, keepdims=True)
        var = ((v - mu) ** 2).mean(-1, keepdims=True)
        y = (v - mu) / jnp.sqrt(var + LN_EPS)
        if g is not None:
            y = y * g + b
        return y

    n = x.shape[0]
    h = params["w_first"].shape[1]
    nd = lap.shape[0]
    x = elu(ln(dot(x, params["w_first"]) + params["b_first"],
               params["ln_gamma"], params["ln_beta"]))
    for l in range(params["alphas"].shape[0]):
        w1, b1, w2, b2 = params["mid"][l]
        dx = ln(dot(elu(dot(x, w1) + b1), w2) + b2)
        dx = (lap @ dx.reshape(nd, -1)).reshape(n, h)
        x = x - params["alphas"][l] * dx
    wd1, bd1, wd2, bd2 = params["decoder"]
    return dot(elu(dot(x, wd1) + bd1), wd2) + bd2


# ----------------------------------- main ------------------------------------
if __name__ == "__main__":
    key = jax.random.PRNGKey(0)

    N = 16                   # num_nodes
    INPUT_DIM = 8
    HIDDEN_CHANNELS = 16
    MAPS_DIM = 2
    HIDDEN_DIM = HIDDEN_CHANNELS * MAPS_DIM   # 32
    OUTPUT_DIM = 4
    N_LAYERS = 2

    k_param, k_x = jax.random.split(key)
    params = make_params(k_param, INPUT_DIM, HIDDEN_DIM, OUTPUT_DIM, N_LAYERS)

    # Synthetic ring graph -> normalized node Laplacian, combined with a fixed
    # non-symmetric rotation restriction map R so every (p, q) block path of the
    # sheaf diffusion (including off-diagonal blocks) is exercised.        (glue)
    idx = jnp.arange(N)
    A = jnp.zeros((N, N), jnp.float32)
    A = A.at[idx, (idx + 1) % N].set(1.0)
    A = A.at[(idx + 1) % N, idx].set(1.0)
    deg = A.sum(axis=1)
    dinv = 1.0 / jnp.sqrt(deg)
    L = jnp.eye(N, dtype=jnp.float32) - dinv[:, None] * A * dinv[None, :]
    th = 0.7
    R = jnp.array([[jnp.cos(th), -jnp.sin(th)],
                   [jnp.sin(th),  jnp.cos(th)]], jnp.float32)     # (MAPS_DIM, MAPS_DIM)
    lap = jnp.kron(L, R)                                          # (N*d, N*d)

    x = jax.random.normal(k_x, (N, INPUT_DIM), jnp.float32)

    out = diffusion_forward(x, params, lap)
    jax.block_until_ready(out)
    assert out.shape == (N, OUTPUT_DIM), out.shape
    assert bool(jnp.all(jnp.isfinite(out)))

    with jax.default_matmul_precision("highest"):
        ref = _reference_forward(x, params, lap)
    assert jnp.allclose(out, ref, rtol=5e-3, atol=5e-3), float(jnp.abs(out - ref).max())

    print("KERNEL_OK")
</pallas_src>

<mosaic_0001>
module attributes {stable_mosaic.version = 11 : i64} {
  func.func @fused_diffusion_kernel(%arg0: memref<2xf32, #tpu.memory_space<smem>>, %arg1: memref<16x8xf32, #tpu.memory_space<vmem>>, %arg2: memref<8x128xbf16, #tpu.memory_space<vmem>>, %arg3: memref<1x128xf32, #tpu.memory_space<vmem>>, %arg4: memref<1x128xf32, #tpu.memory_space<vmem>>, %arg5: memref<1x128xf32, #tpu.memory_space<vmem>>, %arg6: memref<2x128x128xbf16, #tpu.memory_space<vmem>>, %arg7: memref<2x1x128xf32, #tpu.memory_space<vmem>>, %arg8: memref<2x128x128xbf16, #tpu.memory_space<vmem>>, %arg9: memref<2x1x128xf32, #tpu.memory_space<vmem>>, %arg10: memref<4x16x16xf32, #tpu.memory_space<vmem>>, %arg11: memref<2x128x128xf32, #tpu.memory_space<vmem>>, %arg12: memref<2x128x128xf32, #tpu.memory_space<vmem>>, %arg13: memref<128x8xbf16, #tpu.memory_space<vmem>>, %arg14: memref<1x8xf32, #tpu.memory_space<vmem>>, %arg15: memref<8x128xbf16, #tpu.memory_space<vmem>>, %arg16: memref<1x128xf32, #tpu.memory_space<vmem>>, %arg17: memref<16x128xf32, #tpu.memory_space<vmem>>) attributes {dimension_semantics = [], scalar_prefetch = 0 : i64, scratch_operands = 0 : i64, tpu.core_type = #tpu.core_type<tc>} {
    %0 = tpu.iota {dimensions = array<i32: 1>} : vector<1x128xi32>
    %c32_i32 = arith.constant 32 : i32
    %1 = vector.broadcast %c32_i32 : i32 to vector<1x128xi32>
    %2 = arith.cmpi slt, %0, %1 : vector<1x128xi32>
    %3 = arith.extui %2 : vector<1x128xi1> to vector<1x128xi32>
    %4 = arith.sitofp %3 : vector<1x128xi32> to vector<1x128xf32>
    %c0 = arith.constant 0 : index
    %c0_0 = arith.constant 0 : index
    %5 = vector.load %arg1[%c0, %c0_0] : memref<16x8xf32, #tpu.memory_space<vmem>>, vector<16x8xf32>
    %6 = arith.truncf %5 : vector<16x8xf32> to vector<16x8xbf16>
    %c0_1 = arith.constant 0 : index
    %c0_2 = arith.constant 0 : index
    %7 = vector.load %arg2[%c0_1, %c0_2] : memref<8x128xbf16, #tpu.memory_space<vmem>>, vector<8x128xbf16>
    %cst = arith.constant dense<0.000000e+00> : vector<16x128xf32>
    %8 = tpu.matmul %6, %7, %cst {dimension_numbers = #tpu.dot_dimension_numbers<[1], [0], [0], [1], [0, 0, 1, 1], [], []>} : vector<16x8xbf16>, vector<8x128xbf16>, vector<16x128xf32> -> vector<16x128xf32>
    %c0_3 = arith.constant 0 : index
    %c0_4 = arith.constant 0 : index
    %9 = vector.load %arg3[%c0_3, %c0_4] : memref<1x128xf32, #tpu.memory_space<vmem>>, vector<1x128xf32>
    %10 = vector.broadcast %9 : vector<1x128xf32> to vector<16x128xf32>
    %11 = arith.addf %8, %10 : vector<16x128xf32>
    %c0_5 = arith.constant 0 : index
    %c0_6 = arith.constant 0 : index
    %12 = vector.load %arg4[%c0_5, %c0_6] : memref<1x128xf32, #tpu.memory_space<vmem>>, vector<1x128xf32>
    %c0_7 = arith.constant 0 : index
    %c0_8 = arith.constant 0 : index
    %13 = vector.load %arg5[%c0_7, %c0_8] : memref<1x128xf32, #tpu.memory_space<vmem>>, vector<1x128xf32>
    %14 = vector.broadcast %4 : vector<1x128xf32> to vector<16x128xf32>
    %15 = arith.mulf %11, %14 : vector<16x128xf32>
    %cst_9 = arith.constant dense<0.000000e+00> : vector<16xf32>
    %16 = vector.multi_reduction <add>, %15, %cst_9 [1] : vector<16x128xf32> to vector<16xf32>
    %17 = vector.shape_cast %16 : vector<16xf32> to vector<16x1xf32>
    %cst_10 = arith.constant 3.125000e-02 : f32
    %18 = vector.broadcast %cst_10 : f32 to vector<16x1xf32>
    %19 = arith.mulf %17, %18 : vector<16x1xf32>
    %20 = vector.broadcast %19 : vector<16x1xf32> to vector<16x128xf32>
    %21 = arith.subf %11, %20 : vector<16x128xf32>
    %22 = vector.broadcast %4 : vector<1x128xf32> to vector<16x128xf32>
    %23 = arith.mulf %21, %22 : vector<16x128xf32>
    %24 = arith.mulf %23, %23 : vector<16x128xf32>
    %cst_11 = arith.constant dense<0.000000e+00> : vector<16xf32>
    %25 = vector.multi_reduction <add>, %24, %cst_11 [1] : vector<16x128xf32> to vector<16xf32>
    %26 = vector.shape_cast %25 : vector<16xf32> to vector<16x1xf32>
    %cst_12 = arith.constant 3.125000e-02 : f32
    %27 = vector.broadcast %cst_12 : f32 to vector<16x1xf32>
    %28 = arith.mulf %26, %27 : vector<16x1xf32>
    %cst_13 = arith.constant 9.99999974E-6 : f32
    %29 = vector.broadcast %cst_13 : f32 to vector<16x1xf32>
    %30 = arith.addf %28, %29 : vector<16x1xf32>
    %31 = math.rsqrt %30 : vector<16x1xf32>
    %32 = vector.broadcast %31 : vector<16x1xf32> to vector<16x128xf32>
    %33 = arith.mulf %23, %32 : vector<16x128xf32>
    %34 = vector.broadcast %12 : vector<1x128xf32> to vector<16x128xf32>
    %35 = arith.mulf %33, %34 : vector<16x128xf32>
    %36 = vector.broadcast %13 : vector<1x128xf32> to vector<16x128xf32>
    %37 = arith.addf %35, %36 : vector<16x128xf32>
    %cst_14 = arith.constant 0.000000e+00 : f32
    %38 = vector.broadcast %cst_14 : f32 to vector<16x128xf32>
    %39 = arith.cmpf ogt, %37, %38 : vector<16x128xf32>
    %cst_15 = arith.constant 0.000000e+00 : f32
    %40 = vector.broadcast %cst_15 : f32 to vector<16x128xf32>
    %41 = arith.minimumf %37, %40 : vector<16x128xf32>
    %42 = math.exp %41 : vector<16x128xf32>
    %cst_16 = arith.constant 1.000000e+00 : f32
    %43 = vector.broadcast %cst_16 : f32 to vector<16x128xf32>
    %44 = arith.subf %42, %43 : vector<16x128xf32>
    %45 = arith.select %39, %37, %44 : vector<16x128xi1>, vector<16x128xf32>
    %c0_i32 = arith.constant 0 : i32
    %46 = arith.truncf %45 : vector<16x128xf32> to vector<16x128xbf16>
    %47 = arith.index_cast %c0_i32 : i32 to index
    %c0_17 = arith.constant 0 : index
    %c0_18 = arith.constant 0 : index
    %48 = vector.load %arg6[%47, %c0_17, %c0_18] : memref<2x128x128xbf16, #tpu.memory_space<vmem>>, vector<1x128x128xbf16>
    %49 = vector.shape_cast %48 : vector<1x128x128xbf16> to vector<128x128xbf16>
    %cst_19 = arith.constant dense<0.000000e+00> : vector<16x128xf32>
    %50 = tpu.matmul %46, %49, %cst_19 {dimension_numbers = #tpu.dot_dimension_numbers<[1], [0], [0], [1], [0, 0, 1, 1], [], []>} : vector<16x128xbf16>, vector<128x128xbf16>, vector<16x128xf32> -> vector<16x128xf32>
    %51 = arith.index_cast %c0_i32 : i32 to index
    %c0_20 = arith.constant 0 : index
    %c0_21 = arith.constant 0 : index
    %52 = vector.load %arg7[%51, %c0_20, %c0_21] : memref<2x1x128xf32, #tpu.memory_space<vmem>>, vector<1x1x128xf32>
    %53 = vector.shape_cast %52 : vector<1x1x128xf32> to vector<1x128xf32>
    %54 = vector.broadcast %53 : vector<1x128xf32> to vector<16x128xf32>
    %55 = arith.addf %50, %54 : vector<16x128xf32>
    %cst_22 = arith.constant 0.000000e+00 : f32
    %56 = vector.broadcast %cst_22 : f32 to vector<16x128xf32>
    %57 = arith.cmpf ogt, %55, %56 : vector<16x128xf32>
    %cst_23 = arith.constant 0.000000e+00 : f32
    %58 = vector.broadcast %cst_23 : f32 to vector<16x128xf32>
    %59 = arith.minimumf %55, %58 : vector<16x128xf32>
    %60 = math.exp %59 : vector<16x128xf32>
    %cst_24 = arith.constant 1.000000e+00 : f32
    %61 = vector.broadcast %cst_24 : f32 to vector<16x128xf32>
    %62 = arith.subf %60, %61 : vector<16x128xf32>
    %63 = arith.select %57, %55, %62 : vector<16x128xi1>, vector<16x128xf32>
    %64 = arith.truncf %63 : vector<16x128xf32> to vector<16x128xbf16>
    %65 = arith.index_cast %c0_i32 : i32 to index
    %c0_25 = arith.constant 0 : index
    %c0_26 = arith.constant 0 : index
    %66 = vector.load %arg8[%65, %c0_25, %c0_26] : memref<2x128x128xbf16, #tpu.memory_space<vmem>>, vector<1x128x128xbf16>
    %67 = vector.shape_cast %66 : vector<1x128x128xbf16> to vector<128x128xbf16>
    %cst_27 = arith.constant dense<0.000000e+00> : vector<16x128xf32>
    %68 = tpu.matmul %64, %67, %cst_27 {dimension_numbers = #tpu.dot_dimension_numbers<[1], [0], [0], [1], [0, 0, 1, 1], [], []>} : vector<16x128xbf16>, vector<128x128xbf16>, vector<16x128xf32> -> vector<16x128xf32>
    %69 = arith.index_cast %c0_i32 : i32 to index
    %c0_28 = arith.constant 0 : index
    %c0_29 = arith.constant 0 : index
    %70 = vector.load %arg9[%69, %c0_28, %c0_29] : memref<2x1x128xf32, #tpu.memory_space<vmem>>, vector<1x1x128xf32>
    %71 = vector.shape_cast %70 : vector<1x1x128xf32> to vector<1x128xf32>
    %72 = vector.broadcast %71 : vector<1x128xf32> to vector<16x128xf32>
    %73 = arith.addf %68, %72 : vector<16x128xf32>
    %74 = vector.broadcast %4 : vector<1x128xf32> to vector<16x128xf32>
    %75 = arith.mulf %73, %74 : vector<16x128xf32>
    %cst_30 = arith.constant dense<0.000000e+00> : vector<16xf32>
    %76 = vector.multi_reduction <add>, %75, %cst_30 [1] : vector<16x128xf32> to vector<16xf32>
    %77 = vector.shape_cast %76 : vector<16xf32> to vector<16x1xf32>
    %cst_31 = arith.constant 3.125000e-02 : f32
    %78 = vector.broadcast %cst_31 : f32 to vector<16x1xf32>
    %79 = arith.mulf %77, %78 : vector<16x1xf32>
    %80 = vector.broadcast %79 : vector<16x1xf32> to vector<16x128xf32>
    %81 = arith.subf %73, %80 : vector<16x128xf32>
    %82 = vector.broadcast %4 : vector<1x128xf32> to vector<16x128xf32>
    %83 = arith.mulf %81, %82 : vector<16x128xf32>
    %84 = arith.mulf %83, %83 : vector<16x128xf32>
    %cst_32 = arith.constant dense<0.000000e+00> : vector<16xf32>
    %85 = vector.multi_reduction <add>, %84, %cst_32 [1] : vector<16x128xf32> to vector<16xf32>
    %86 = vector.shape_cast %85 : vector<16xf32> to vector<16x1xf32>
    %cst_33 = arith.constant 3.125000e-02 : f32
    %87 = vector.broadcast %cst_33 : f32 to vector<16x1xf32>
    %88 = arith.mulf %86, %87 : vector<16x1xf32>
    %cst_34 = arith.constant 9.99999974E-6 : f32
    %89 = vector.broadcast %cst_34 : f32 to vector<16x1xf32>
    %90 = arith.addf %88, %89 : vector<16x1xf32>
    %91 = math.rsqrt %90 : vector<16x1xf32>
    %92 = vector.broadcast %91 : vector<16x1xf32> to vector<16x128xf32>
    %93 = arith.mulf %83, %92 : vector<16x128xf32>
    %c0_35 = arith.constant 0 : index
    %c0_36 = arith.constant 0 : index
    %c0_37 = arith.constant 0 : index
    %94 = vector.load %arg11[%c0_35, %c0_36, %c0_37] : memref<2x128x128xf32, #tpu.memory_space<vmem>>, vector<1x128x128xf32>
    %95 = vector.shape_cast %94 : vector<1x128x128xf32> to vector<128x128xf32>
    %cst_38 = arith.constant dense<0.000000e+00> : vector<16x128xf32>
    %96 = tpu.matmul %93, %95, %cst_38 {dimension_numbers = #tpu.dot_dimension_numbers<[1], [0], [0], [1], [0, 0, 1, 1], [], []>} : vector<16x128xf32>, vector<128x128xf32>, vector<16x128xf32> -> vector<16x128xf32>
    %c1 = arith.constant 1 : index
    %c0_39 = arith.constant 0 : index
    %c0_40 = arith.constant 0 : index
    %97 = vector.load %arg11[%c1, %c0_39, %c0_40] : memref<2x128x128xf32, #tpu.memory_space<vmem>>, vector<1x128x128xf32>
    %98 = vector.shape_cast %97 : vector<1x128x128xf32> to vector<128x128xf32>
    %cst_41 = arith.constant dense<0.000000e+00> : vector<16x128xf32>
    %99 = tpu.matmul %93, %98, %cst_41 {dimension_numbers = #tpu.dot_dimension_numbers<[1], [0], [0], [1], [0, 0, 1, 1], [], []>} : vector<16x128xf32>, vector<128x128xf32>, vector<16x128xf32> -> vector<16x128xf32>
    %c0_42 = arith.constant 0 : index
    %c0_43 = arith.constant 0 : index
    %c0_44 = arith.constant 0 : index
    %100 = vector.load %arg10[%c0_42, %c0_43, %c0_44] : memref<4x16x16xf32, #tpu.memory_space<vmem>>, vector<1x16x16xf32>
    %101 = vector.shape_cast %100 : vector<1x16x16xf32> to vector<16x16xf32>
    %cst_45 = arith.constant dense<0.000000e+00> : vector<16x128xf32>
    %102 = tpu.matmul %101, %96, %cst_45 {dimension_numbers = #tpu.dot_dimension_numbers<[1], [0], [0], [1], [0, 0, 1, 1], [], []>} : vector<16x16xf32>, vector<16x128xf32>, vector<16x128xf32> -> vector<16x128xf32>
    %c1_46 = arith.constant 1 : index
    %c0_47 = arith.constant 0 : index
    %c0_48 = arith.constant 0 : index
    %103 = vector.load %arg10[%c1_46, %c0_47, %c0_48] : memref<4x16x16xf32, #tpu.memory_space<vmem>>, vector<1x16x16xf32>
    %104 = vector.shape_cast %103 : vector<1x16x16xf32> to vector<16x16xf32>
    %cst_49 = arith.constant dense<0.000000e+00> : vector<16x128xf32>
    %105 = tpu.matmul %104, %99, %cst_49 {dimension_numbers = #tpu.dot_dimension_numbers<[1], [0], [0], [1], [0, 0, 1, 1], [], []>} : vector<16x16xf32>, vector<16x128xf32>, vector<16x128xf32> -> vector<16x128xf32>
    %106 = arith.addf %102, %105 : vector<16x128xf32>
    %c0_50 = arith.constant 0 : index
    %c0_51 = arith.constant 0 : index
    %c0_52 = arith.constant 0 : index
    %107 = vector.load %arg12[%c0_50, %c0_51, %c0_52] : memref<2x128x128xf32, #tpu.memory_space<vmem>>, vector<1x128x128xf32>
    %108 = vector.shape_cast %107 : vector<1x128x128xf32> to vector<128x128xf32>
    %cst_53 = arith.constant dense<0.000000e+00> : vector<16x128xf32>
    %109 = tpu.matmul %106, %108, %cst_53 {dimension_numbers = #tpu.dot_dimension_numbers<[1], [0], [0], [1], [0, 0, 1, 1], [], []>} : vector<16x128xf32>, vector<128x128xf32>, vector<16x128xf32> -> vector<16x128xf32>
    %c2 = arith.constant 2 : index
    %c0_54 = arith.constant 0 : index
    %c0_55 = arith.constant 0 : index
    %110 = vector.load %arg10[%c2, %c0_54, %c0_55] : memref<4x16x16xf32, #tpu.memory_space<vmem>>, vector<1x16x16xf32>
    %111 = vector.shape_cast %110 : vector<1x16x16xf32> to vector<16x16xf32>
    %cst_56 = arith.constant dense<0.000000e+00> : vector<16x128xf32>
    %112 = tpu.matmul %111, %96, %cst_56 {dimension_numbers = #tpu.dot_dimension_numbers<[1], [0], [0], [1], [0, 0, 1, 1], [], []>} : vector<16x16xf32>, vector<16x128xf32>, vector<16x128xf32> -> vector<16x128xf32>
    %c3 = arith.constant 3 : index
    %c0_57 = arith.constant 0 : index
    %c0_58 = arith.constant 0 : index
    %113 = vector.load %arg10[%c3, %c0_57, %c0_58] : memref<4x16x16xf32, #tpu.memory_space<vmem>>, vector<1x16x16xf32>
    %114 = vector.shape_cast %113 : vector<1x16x16xf32> to vector<16x16xf32>
    %cst_59 = arith.constant dense<0.000000e+00> : vector<16x128xf32>
    %115 = tpu.matmul %114, %99, %cst_59 {dimension_numbers = #tpu.dot_dimension_numbers<[1], [0], [0], [1], [0, 0, 1, 1], [], []>} : vector<16x16xf32>, vector<16x128xf32>, vector<16x128xf32> -> vector<16x128xf32>
    %116 = arith.addf %112, %115 : vector<16x128xf32>
    %c1_60 = arith.constant 1 : index
    %c0_61 = arith.constant 0 : index
    %c0_62 = arith.constant 0 : index
    %117 = vector.load %arg12[%c1_60, %c0_61, %c0_62] : memref<2x128x128xf32, #tpu.memory_space<vmem>>, vector<1x128x128xf32>
    %118 = vector.shape_cast %117 : vector<1x128x128xf32> to vector<128x128xf32>
    %cst_63 = arith.constant dense<0.000000e+00> : vector<16x128xf32>
    %119 = tpu.matmul %116, %118, %cst_63 {dimension_numbers = #tpu.dot_dimension_numbers<[1], [0], [0], [1], [0, 0, 1, 1], [], []>} : vector<16x128xf32>, vector<128x128xf32>, vector<16x128xf32> -> vector<16x128xf32>
    %120 = arith.addf %109, %119 : vector<16x128xf32>
    %121 = arith.index_cast %c0_i32 : i32 to index
    %122 = memref.load %arg0[%121] : memref<2xf32, #tpu.memory_space<smem>>
    %123 = vector.broadcast %122 : f32 to vector<16x128xf32>
    %124 = arith.mulf %123, %120 : vector<16x128xf32>
    %125 = arith.subf %45, %124 : vector<16x128xf32>
    %c1_i32 = arith.constant 1 : i32
    %126 = arith.truncf %125 : vector<16x128xf32> to vector<16x128xbf16>
    %127 = arith.index_cast %c1_i32 : i32 to index
    %c0_64 = arith.constant 0 : index
    %c0_65 = arith.constant 0 : index
    %128 = vector.load %arg6[%127, %c0_64, %c0_65] : memref<2x128x128xbf16, #tpu.memory_space<vmem>>, vector<1x128x128xbf16>
    %129 = vector.shape_cast %128 : vector<1x128x128xbf16> to vector<128x128xbf16>
    %cst_66 = arith.constant dense<0.000000e+00> : vector<16x128xf32>
    %130 = tpu.matmul %126, %129, %cst_66 {dimension_numbers = #tpu.dot_dimension_numbers<[1], [0], [0], [1], [0, 0, 1, 1], [], []>} : vector<16x128xbf16>, vector<128x128xbf16>, vector<16x128xf32> -> vector<16x128xf32>
    %131 = arith.index_cast %c1_i32 : i32 to index
    %c0_67 = arith.constant 0 : index
    %c0_68 = arith.constant 0 : index
    %132 = vector.load %arg7[%131, %c0_67, %c0_68] : memref<2x1x128xf32, #tpu.memory_space<vmem>>, vector<1x1x128xf32>
    %133 = vector.shape_cast %132 : vector<1x1x128xf32> to vector<1x128xf32>
    %134 = vector.broadcast %133 : vector<1x128xf32> to vector<16x128xf32>
    %135 = arith.addf %130, %134 : vector<16x128xf32>
    %cst_69 = arith.constant 0.000000e+00 : f32
    %136 = vector.broadcast %cst_69 : f32 to vector<16x128xf32>
    %137 = arith.cmpf ogt, %135, %136 : vector<16x128xf32>
    %cst_70 = arith.constant 0.000000e+00 : f32
    %138 = vector.broadcast %cst_70 : f32 to vector<16x128xf32>
    %139 = arith.minimumf %135, %138 : vector<16x128xf32>
    %140 = math.exp %139 : vector<16x128xf32>
    %cst_71 = arith.constant 1.000000e+00 : f32
    %141 = vector.broadcast %cst_71 : f32 to vector<16x128xf32>
    %142 = arith.subf %140, %141 : vector<16x128xf32>
    %143 = arith.select %137, %135, %142 : vector<16x128xi1>, vector<16x128xf32>
    %144 = arith.truncf %143 : vector<16x128xf32> to vector<16x128xbf16>
    %145 = arith.index_cast %c1_i32 : i32 to index
    %c0_72 = arith.constant 0 : index
    %c0_73 = arith.constant 0 : index
    %146 = vector.load %arg8[%145, %c0_72, %c0_73] : memref<2x128x128xbf16, #tpu.memory_space<vmem>>, vector<1x128x128xbf16>
    %147 = vector.shape_cast %146 : vector<1x128x128xbf16> to vector<128x128xbf16>
    %cst_74 = arith.constant dense<0.000000e+00> : vector<16x128xf32>
    %148 = tpu.matmul %144, %147, %cst_74 {dimension_numbers = #tpu.dot_dimension_numbers<[1], [0], [0], [1], [0, 0, 1, 1], [], []>} : vector<16x128xbf16>, vector<128x128xbf16>, vector<16x128xf32> -> vector<16x128xf32>
    %149 = arith.index_cast %c1_i32 : i32 to index
    %c0_75 = arith.constant 0 : index
    %c0_76 = arith.constant 0 : index
    %150 = vector.load %arg9[%149, %c0_75, %c0_76] : memref<2x1x128xf32, #tpu.memory_space<vmem>>, vector<1x1x128xf32>
    %151 = vector.shape_cast %150 : vector<1x1x128xf32> to vector<1x128xf32>
    %152 = vector.broadcast %151 : vector<1x128xf32> to vector<16x128xf32>
    %153 = arith.addf %148, %152 : vector<16x128xf32>
    %154 = vector.broadcast %4 : vector<1x128xf32> to vector<16x128xf32>
    %155 = arith.mulf %153, %154 : vector<16x128xf32>
    %cst_77 = arith.constant dense<0.000000e+00> : vector<16xf32>
    %156 = vector.multi_reduction <add>, %155, %cst_77 [1] : vector<16x128xf32> to vector<16xf32>
    %157 = vector.shape_cast %156 : vector<16xf32> to vector<16x1xf32>
    %cst_78 = arith.constant 3.125000e-02 : f32
    %158 = vector.broadcast %cst_78 : f32 to vector<16x1xf32>
    %159 = arith.mulf %157, %158 : vector<16x1xf32>
    %160 = vector.broadcast %159 : vector<16x1xf32> to vector<16x128xf32>
    %161 = arith.subf %153, %160 : vector<16x128xf32>
    %162 = vector.broadcast %4 : vector<1x128xf32> to vector<16x128xf32>
    %163 = arith.mulf %161, %162 : vector<16x128xf32>
    %164 = arith.mulf %163, %163 : vector<16x128xf32>
    %cst_79 = arith.constant dense<0.000000e+00> : vector<16xf32>
    %165 = vector.multi_reduction <add>, %164, %cst_79 [1] : vector<16x128xf32> to vector<16xf32>
    %166 = vector.shape_cast %165 : vector<16xf32> to vector<16x1xf32>
    %cst_80 = arith.constant 3.125000e-02 : f32
    %167 = vector.broadcast %cst_80 : f32 to vector<16x1xf32>
    %168 = arith.mulf %166, %167 : vector<16x1xf32>
    %cst_81 = arith.constant 9.99999974E-6 : f32
    %169 = vector.broadcast %cst_81 : f32 to vector<16x1xf32>
    %170 = arith.addf %168, %169 : vector<16x1xf32>
    %171 = math.rsqrt %170 : vector<16x1xf32>
    %172 = vector.broadcast %171 : vector<16x1xf32> to vector<16x128xf32>
    %173 = arith.mulf %163, %172 : vector<16x128xf32>
    %c0_82 = arith.constant 0 : index
    %c0_83 = arith.constant 0 : index
    %c0_84 = arith.constant 0 : index
    %174 = vector.load %arg11[%c0_82, %c0_83, %c0_84] : memref<2x128x128xf32, #tpu.memory_space<vmem>>, vector<1x128x128xf32>
    %175 = vector.shape_cast %174 : vector<1x128x128xf32> to vector<128x128xf32>
    %cst_85 = arith.constant dense<0.000000e+00> : vector<16x128xf32>
    %176 = tpu.matmul %173, %175, %cst_85 {dimension_numbers = #tpu.dot_dimension_numbers<[1], [0], [0], [1], [0, 0, 1, 1], [], []>} : vector<16x128xf32>, vector<128x128xf32>, vector<16x128xf32> -> vector<16x128xf32>
    %c1_86 = arith.constant 1 : index
    %c0_87 = arith.constant 0 : index
    %c0_88 = arith.constant 0 : index
    %177 = vector.load %arg11[%c1_86, %c0_87, %c0_88] : memref<2x128x128xf32, #tpu.memory_space<vmem>>, vector<1x128x128xf32>
    %178 = vector.shape_cast %177 : vector<1x128x128xf32> to vector<128x128xf32>
    %cst_89 = arith.constant dense<0.000000e+00> : vector<16x128xf32>
    %179 = tpu.matmul %173, %178, %cst_89 {dimension_numbers = #tpu.dot_dimension_numbers<[1], [0], [0], [1], [0, 0, 1, 1], [], []>} : vector<16x128xf32>, vector<128x128xf32>, vector<16x128xf32> -> vector<16x128xf32>
    %c0_90 = arith.constant 0 : index
    %c0_91 = arith.constant 0 : index
    %c0_92 = arith.constant 0 : index
    %180 = vector.load %arg10[%c0_90, %c0_91, %c0_92] : memref<4x16x16xf32, #tpu.memory_space<vmem>>, vector<1x16x16xf32>
    %181 = vector.shape_cast %180 : vector<1x16x16xf32> to vector<16x16xf32>
    %cst_93 = arith.constant dense<0.000000e+00> : vector<16x128xf32>
    %182 = tpu.matmul %181, %176, %cst_93 {dimension_numbers = #tpu.dot_dimension_numbers<[1], [0], [0], [1], [0, 0, 1, 1], [], []>} : vector<16x16xf32>, vector<16x128xf32>, vector<16x128xf32> -> vector<16x128xf32>
    %c1_94 = arith.constant 1 : index
    %c0_95 = arith.constant 0 : index
    %c0_96 = arith.constant 0 : index
    %183 = vector.load %arg10[%c1_94, %c0_95, %c0_96] : memref<4x16x16xf32, #tpu.memory_space<vmem>>, vector<1x16x16xf32>
    %184 = vector.shape_cast %183 : vector<1x16x16xf32> to vector<16x16xf32>
    %cst_97 = arith.constant dense<0.000000e+00> : vector<16x128xf32>
    %185 = tpu.matmul %184, %179, %cst_97 {dimension_numbers = #tpu.dot_dimension_numbers<[1], [0], [0], [1], [0, 0, 1, 1], [], []>} : vector<16x16xf32>, vector<16x128xf32>, vector<16x128xf32> -> vector<16x128xf32>
    %186 = arith.addf %182, %185 : vector<16x128xf32>
    %c0_98 = arith.constant 0 : index
    %c0_99 = arith.constant 0 : index
    %c0_100 = arith.constant 0 : index
    %187 = vector.load %arg12[%c0_98, %c0_99, %c0_100] : memref<2x128x128xf32, #tpu.memory_space<vmem>>, vector<1x128x128xf32>
    %188 = vector.shape_cast %187 : vector<1x128x128xf32> to vector<128x128xf32>
    %cst_101 = arith.constant dense<0.000000e+00> : vector<16x128xf32>
    %189 = tpu.matmul %186, %188, %cst_101 {dimension_numbers = #tpu.dot_dimension_numbers<[1], [0], [0], [1], [0, 0, 1, 1], [], []>} : vector<16x128xf32>, vector<128x128xf32>, vector<16x128xf32> -> vector<16x128xf32>
    %c2_102 = arith.constant 2 : index
    %c0_103 = arith.constant 0 : index
    %c0_104 = arith.constant 0 : index
    %190 = vector.load %arg10[%c2_102, %c0_103, %c0_104] : memref<4x16x16xf32, #tpu.memory_space<vmem>>, vector<1x16x16xf32>
    %191 = vector.shape_cast %190 : vector<1x16x16xf32> to vector<16x16xf32>
    %cst_105 = arith.constant dense<0.000000e+00> : vector<16x128xf32>
    %192 = tpu.matmul %191, %176, %cst_105 {dimension_numbers = #tpu.dot_dimension_numbers<[1], [0], [0], [1], [0, 0, 1, 1], [], []>} : vector<16x16xf32>, vector<16x128xf32>, vector<16x128xf32> -> vector<16x128xf32>
    %c3_106 = arith.constant 3 : index
    %c0_107 = arith.constant 0 : index
    %c0_108 = arith.constant 0 : index
    %193 = vector.load %arg10[%c3_106, %c0_107, %c0_108] : memref<4x16x16xf32, #tpu.memory_space<vmem>>, vector<1x16x16xf32>
    %194 = vector.shape_cast %193 : vector<1x16x16xf32> to vector<16x16xf32>
    %cst_109 = arith.constant dense<0.000000e+00> : vector<16x128xf32>
    %195 = tpu.matmul %194, %179, %cst_109 {dimension_numbers = #tpu.dot_dimension_numbers<[1], [0], [0], [1], [0, 0, 1, 1], [], []>} : vector<16x16xf32>, vector<16x128xf32>, vector<16x128xf32> -> vector<16x128xf32>
    %196 = arith.addf %192, %195 : vector<16x128xf32>
    %c1_110 = arith.constant 1 : index
    %c0_111 = arith.constant 0 : index
    %c0_112 = arith.constant 0 : index
    %197 = vector.load %arg12[%c1_110, %c0_111, %c0_112] : memref<2x128x128xf32, #tpu.memory_space<vmem>>, vector<1x128x128xf32>
    %198 = vector.shape_cast %197 : vector<1x128x128xf32> to vector<128x128xf32>
    %cst_113 = arith.constant dense<0.000000e+00> : vector<16x128xf32>
    %199 = tpu.matmul %196, %198, %cst_113 {dimension_numbers = #tpu.dot_dimension_numbers<[1], [0], [0], [1], [0, 0, 1, 1], [], []>} : vector<16x128xf32>, vector<128x128xf32>, vector<16x128xf32> -> vector<16x128xf32>
    %200 = arith.addf %189, %199 : vector<16x128xf32>
    %201 = arith.index_cast %c1_i32 : i32 to index
    %202 = memref.load %arg0[%201] : memref<2xf32, #tpu.memory_space<smem>>
    %203 = vector.broadcast %202 : f32 to vector<16x128xf32>
    %204 = arith.mulf %203, %200 : vector<16x128xf32>
    %205 = arith.subf %125, %204 : vector<16x128xf32>
    %c2_i32 = arith.constant 2 : i32
    %206 = arith.truncf %205 : vector<16x128xf32> to vector<16x128xbf16>
    %c0_114 = arith.constant 0 : index
    %c0_115 = arith.constant 0 : index
    %207 = vector.load %arg13[%c0_114, %c0_115] : memref<128x8xbf16, #tpu.memory_space<vmem>>, vector<128x8xbf16>
    %cst_116 = arith.constant dense<0.000000e+00> : vector<16x8xf32>
    %208 = tpu.matmul %206, %207, %cst_116 {dimension_numbers = #tpu.dot_dimension_numbers<[1], [0], [0], [1], [0, 0, 1, 1], [], []>} : vector<16x128xbf16>, vector<128x8xbf16>, vector<16x8xf32> -> vector<16x8xf32>
    %c0_117 = arith.constant 0 : index
    %c0_118 = arith.constant 0 : index
    %209 = vector.load %arg14[%c0_117, %c0_118] : memref<1x8xf32, #tpu.memory_space<vmem>>, vector<1x8xf32>
    %210 = vector.broadcast %209 : vector<1x8xf32> to vector<16x8xf32>
    %211 = arith.addf %208, %210 : vector<16x8xf32>
    %cst_119 = arith.constant 0.000000e+00 : f32
    %212 = vector.broadcast %cst_119 : f32 to vector<16x8xf32>
    %213 = arith.cmpf ogt, %211, %212 : vector<16x8xf32>
    %cst_120 = arith.constant 0.000000e+00 : f32
    %214 = vector.broadcast %cst_120 : f32 to vector<16x8xf32>
    %215 = arith.minimumf %211, %214 : vector<16x8xf32>
    %216 = math.exp %215 : vector<16x8xf32>
    %cst_121 = arith.constant 1.000000e+00 : f32
    %217 = vector.broadcast %cst_121 : f32 to vector<16x8xf32>
    %218 = arith.subf %216, %217 : vector<16x8xf32>
    %219 = arith.select %213, %211, %218 : vector<16x8xi1>, vector<16x8xf32>
    %220 = arith.truncf %219 : vector<16x8xf32> to vector<16x8xbf16>
    %c0_122 = arith.constant 0 : index
    %c0_123 = arith.constant 0 : index
    %221 = vector.load %arg15[%c0_122, %c0_123] : memref<8x128xbf16, #tpu.memory_space<vmem>>, vector<8x128xbf16>
    %cst_124 = arith.constant dense<0.000000e+00> : vector<16x128xf32>
    %222 = tpu.matmul %220, %221, %cst_124 {dimension_numbers = #tpu.dot_dimension_numbers<[1], [0], [0], [1], [0, 0, 1, 1], [], []>} : vector<16x8xbf16>, vector<8x128xbf16>, vector<16x128xf32> -> vector<16x128xf32>
    %c0_125 = arith.constant 0 : index
    %c0_126 = arith.constant 0 : index
    %223 = vector.load %arg16[%c0_125, %c0_126] : memref<1x128xf32, #tpu.memory_space<vmem>>, vector<1x128xf32>
    %224 = vector.broadcast %223 : vector<1x128xf32> to vector<16x128xf32>
    %225 = arith.addf %222, %224 : vector<16x128xf32>
    %c0_127 = arith.constant 0 : index
    %c0_128 = arith.constant 0 : index
    %226 = vector.load %arg17[%c0_127, %c0_128] : memref<16x128xf32, #tpu.memory_space<vmem>>, vector<16x128xf32>
    tpu.vector_store %arg17[%c0_127, %c0_128], %225 {strides = array<i32>} : memref<16x128xf32, #tpu.memory_space<vmem>>, vector<16x128xf32>,
    return
  }
}

</mosaic_0001>

<bundles_post_ra>
// kernel: diffusion_forward.1
= control target key start
LH: loop header
LB: loop body
LE: loop exit
PB: predicated region body
PF: predicated region fallthrough
CT: control target
= control target key end

     0   :  { %s4240_s0 = inlined_call_operand.vmem [shape: f32[2], index: 0, kind: input, shape index: {}]   ;;  %s4241_s1 = inlined_call_operand.vmem [shape: f32[16,8], index: 1, kind: input, shape index: {}]   ;;  %s4242_s2 = inlined_call_operand.vmem [shape: bf16[8,128], index: 2, kind: input, shape index: {}]   ;;  %s4243_s3 = inlined_call_operand.vmem [shape: f32[1,128], index: 3, kind: input, shape index: {}]   ;;  %s4244_s4 = inlined_call_operand.vmem [shape: f32[1,128], index: 4, kind: input, shape index: {}]   ;;  %s4245_s5 = inlined_call_operand.vmem [shape: f32[1,128], index: 5, kind: input, shape index: {}]   ;;  %s4246_s6 = inlined_call_operand.vmem [shape: bf16[2,128,128], index: 6, kind: input, shape index: {}]   ;;  %s4247_s7 = inlined_call_operand.vmem [shape: f32[2,1,128], index: 7, kind: input, shape index: {}]   ;;  %s4248_s8 = inlined_call_operand.vmem [shape: bf16[2,128,128], index: 8, kind: input, shape index: {}]   ;;  %s4249_s9 = inlined_call_operand.vmem [shape: f32[2,1,128], index: 9, kind: input, shape index: {}]   ;;  %s4250_s10 = inlined_call_operand.vmem [shape: f32[4,16,16], index: 10, kind: input, shape index: {}]   ;;  %s4251_s11 = inlined_call_operand.vmem [shape: f32[2,128,128], index: 11, kind: input, shape index: {}]   ;;  %s4252_s12 = inlined_call_operand.vmem [shape: f32[2,128,128], index: 12, kind: input, shape index: {}]   ;;  %s4253_s13 = inlined_call_operand.vmem [shape: bf16[128,8], index: 13, kind: input, shape index: {}]   ;;  %s4254_s14 = inlined_call_operand.vmem [shape: f32[1,8], index: 14, kind: input, shape index: {}]   ;;  %s4255_s15 = inlined_call_operand.vmem [shape: bf16[8,128], index: 15, kind: input, shape index: {}]   ;;  %s4256_s16 = inlined_call_operand.vmem [shape: f32[1,128], index: 16, kind: input, shape index: {}]   ;;  %s4257_s17 = inlined_call_operand.vmem [shape: f32[16,128], index: 17, kind: output, shape index: {}]  }
   0x1   :  { %4259 = sst [smem:[#allocation5_spill]] %s4240_s0 }
   0x2   :  { %4260 = sst [smem:[#allocation6_spill]] %s4241_s1 }
   0x3   :  { %22 = vsyncpa [#allocation3], 0  ;;  %s4261_s26 = sld [smem:[#allocation5_spill]] }
   0x9   :  { %s29_s27 = sshll.u32 %s4261_s26, 4  ;;  %s30_s27 = int_to_ptr.vmem [resolvable:$true] %s29_s27 }
   0xa   :  { %s3418_s28 = scalar_lea.vmem %s30_s27, 16  ;;  %p3423_p1 = scmp.lt.s32.totalorder %s30_s27, %s30_s27 }
   0xb   :  { %p3419_p0 = scmp.ne.s32.totalorder %s30_s27, %s3418_s28  ;;  %p3424_p2 = scmp.lt.s32.totalorder %s3418_s28, %s3418_s28 }
   0xd   :  { %p3425_p3 = por %p3424_p2, %p3423_p1 }
   0xf   :  { %p3426_p4 = pnand %p3425_p3, %p3419_p0 }
  0x11   :  { %3429 = shalt.err (!%p3426_p4)
}
  0x12   :  { %s3432_s29 = smov [#allocation2]  }
  0x13   :  { %32 = dma.vmem_to_smem %s30_s27, 16, %s3432_s29, [#allocation3]  }
  0x14   :  { %3430 = dma.done.wait [#allocation3], 16  }
  0x15   :  { %3431 = vsyncadd [#allocation3], 4294967280 }
  0x16   :  { %68 = sfence }
  0x17   :  { %v78_v0 = vld [vmem:[%s4242_s2] sm:$0xf]  ;;  %vm90_vm0 = vcmask 1043456   ;;  %v3433_v1 = vmov 0.0   ;;  %s4262_s1 = sld [smem:[#allocation6_spill]]  ;;  %vm3434_vm1 = vmmov 0   ;;  %v70_v6 = vlaneseq }
  0x18   :  { %2599 = vmatprep.subr.bf16.mxu0 %v3433_v1  ;;  %v92_v2 = vsel %vm90_vm0, %v78_v0, 0  ;;  %2605 = vmatprep.subr.bf16.mxu1 %v3433_v1  ;;  %vm86_vm2 = vcmask 64512   ;;  %v2226_v8 = vld [vmem:[%s4243_s3] ss:$0 sm:$0xff]  ;;  %v3351_v29 = vld [vmem:[%s4246_s6 + $0x8] sm:$0xff]   ;;  %v3352_v30 = vld [vmem:[%s4246_s6 + $0x10] sm:$0xff]  }
  0x19   :  { %2600 = vmatpush3.bf16.msra.mxu0 %v92_v2  ;;  %2601 = vmatprep.mubr.msk.bf16.mxu0 %vm3434_vm1, %v3433_v1  ;;  %v71_v7 = vand.u32 127, %v70_v6  ;;  %v3350_v28 = vld [vmem:[%s4246_s6] sm:$0xff]   ;;  %v3353_v31 = vld [vmem:[%s4246_s6 + $0x18] sm:$0xff]   ;;  %v3355_v33 = vld [vmem:[%s4246_s6 + $0x28] sm:$0xff]   ;;  %vm643_vm8 = vcmask 130048   ;;  %s1157_s25 = sld [smem:[#allocation2]] }
  0x1a   :  { %2621 = vmatprep.mubr.msk.bf16.mxu1 %vm3434_vm1, %v3433_v1  ;;  %2625 = vmatprep.subr.bf16.mxu0 %v3433_v1  ;;  %v3354_v32 = vld [vmem:[%s4246_s6 + $0x20] sm:$0xff]   ;;  %v3356_v34 = vld [vmem:[%s4246_s6 + $0x30] sm:$0xff]   ;;  %v3357_v35 = vld [vmem:[%s4246_s6 + $0x38] sm:$0xff]  }
  0x1b   :  { %vm72_vm3 = vcmp.lt.s32.totalorder %v71_v7, 32  ;;  %2606 = vmatpush3.bf16.msra.mxu1 %v3350_v28  ;;  %v3358_v36 = vld [vmem:[%s4248_s8] sm:$0xff]   ;;  %v3359_v37 = vld [vmem:[%s4248_s8 + $0x8] sm:$0xff]   ;;  %v3360_v2 = vld [vmem:[%s4248_s8 + $0x10] sm:$0xff]  }
  0x1c   :  { %v3552_v10 = vsel %vm72_vm3, 1.0, %v3433_v1  ;;  %2607 = vmatprep.subr.bf16.mxu1 %v3433_v1  ;;  %v2228_v45 = vld [vmem:[%s4244_s4] ss:$0 sm:$0xff]  ;;  %v3364_v6 = vld [vmem:[%s4248_s8 + $0x30] sm:$0xff]   ;;  %v3365_v7 = vld [vmem:[%s4248_s8 + $0x38] sm:$0xff]  }
  0x1d   :  { %v75_v3 = vld [vmem:[%s4262_s1] sm:$0xff]  ;;  %v76_v4 = vld [vmem:[%s4262_s1 + $0x8] sm:$0xff] }
  0x1e   :  { %v77_v5 = vpack.c.bf16 %v76_v4, %v75_v3  ;;  %v2229_v47 = vld [vmem:[%s4245_s5] ss:$0 sm:$0xff]  ;;  %v3361_v3 = vld [vmem:[%s4248_s8 + $0x18] sm:$0xff]  }
  0x1f   :  { %2608 = vmatpush3.bf16.msra.mxu1 %v3351_v29  ;;  %v3362_v4 = vld [vmem:[%s4248_s8 + $0x20] sm:$0xff]  }
  0x20   :  { %2602 = vmatmul.mubr.msk.bf16.vlgmr.msra.gmra.mrb[0].mxu0 %vm86_vm2, %v77_v5  ;;  %2609 = vmatprep.subr.bf16.mxu1 %v3433_v1  ;;  %v3363_v5 = vld [vmem:[%s4248_s8 + $0x28] sm:$0xff]  }
  0x21   :  { %2641 = vmatprep.mubr.msk.bf16.mxu0 %vm3434_vm1, %v3433_v1  ;;  %2626 = vmatpush3.bf16.msra.mxu0 %v3358_v36  ;;  %v455_v36 = vld [vmem:[%s4251_s11] sm:$0xff] }
  0x22   :  { %2627 = vmatprep.subr.bf16.mxu0 %v3433_v1 }
  0x23   :  { %2610 = vmatpush3.bf16.msra.mxu1 %v3352_v30 }
  0x24   :  { %2611 = vmatprep.subr.bf16.mxu1 %v3433_v1 }
  0x25   :  { %2628 = vmatpush3.bf16.msra.mxu0 %v3359_v37  ;;  %v456_v37 = vld [vmem:[%s4251_s11 + $0x8] sm:$0xff] }
  0x26   :  { %2629 = vmatprep.subr.bf16.mxu0 %v3433_v1 }
  0x27   :  { %2612 = vmatpush3.bf16.msra.mxu1 %v3353_v31 }
  0x28   :  { %2613 = vmatprep.subr.bf16.mxu1 %v3433_v1 }
  0x29   :  { %2630 = vmatpush3.bf16.msra.mxu0 %v3360_v2 }
  0x2a   :  { %2631 = vmatprep.subr.bf16.mxu0 %v3433_v1 }
  0x2b   :  { %2614 = vmatpush3.bf16.msra.mxu1 %v3354_v32 }
  0x2c   :  { %2615 = vmatprep.subr.bf16.mxu1 %v3433_v1 }
  0x2d   :  { %2632 = vmatpush3.bf16.msra.mxu0 %v3361_v3 }
  0x2e   :  { %2633 = vmatprep.subr.bf16.mxu0 %v3433_v1 }
  0x2f   :  { %2616 = vmatpush3.bf16.msra.mxu1 %v3355_v33 }
  0x30   :  { %2617 = vmatprep.subr.bf16.mxu1 %v3433_v1 }
  0x31   :  { %2634 = vmatpush3.bf16.msra.mxu0 %v3362_v4 }
  0x32   :  { %2635 = vmatprep.subr.bf16.mxu0 %v3433_v1 }
  0x33   :  { %2618 = vmatpush3.bf16.msra.mxu1 %v3356_v34 }
  0x34   :  { %2619 = vmatprep.subr.bf16.mxu1 %v3433_v1 }
  0x35   :  { %2636 = vmatpush3.bf16.msra.mxu0 %v3363_v5 }
  0x36   :  { %2637 = vmatprep.subr.bf16.mxu0 %v3433_v1 }
  0x37   :  { %2620 = vmatpush3.bf16.msra.mxu1 %v3357_v35 }
  0x39   :  { %2638 = vmatpush3.bf16.msra.mxu0 %v3364_v6 }
  0x3a   :  { %2639 = vmatprep.subr.bf16.mxu0 %v3433_v1 }
  0x3d   :  { %2640 = vmatpush3.bf16.msra.mxu0 %v3365_v7 }
  0xf3   :  { %v128_v9 = vpop.f32.mrb[0].mxu0 }
  0xf4   :  { %v129_v11 = vadd.f32 %v2226_v8, %v128_v9  ;;  %v2603_v12 = vpop.f32.mrb[1].mxu0 }
  0xf5   :  { %v131_v13 = vpop.f32.mrb[2].mxu0 }
  0xf6   :  { %v132_v14 = vadd.f32 %v2226_v8, %v131_v13  ;;  %v2604_v15 = vpop.f32.mrb[3].mxu0  ;;  %v137_v16 = vmul.f32 %v3552_v10, %v129_v11  ;;  %v2232_v8 = vld [vmem:[%s4247_s7] ss:$0 sm:$0xff] }
  0xf8   :  { %139 = vadd.xlane.f32.xlu0 %v137_v16  ;;  %v138_v17 = vmul.f32 %v3552_v10, %v132_v14 }
  0xfc   :  { %141 = vadd.xlane.f32.xlu0 %v138_v17 }
 0x185   :  { %v140_v18 = vpop.xlane.xlu0 %139 }
 0x186   :  { %v143_v19 = vmul.f32 0.03125, %v140_v18 }
 0x188   :  { %v145_v20 = vsub.f32 %v129_v11, %v143_v19 }
 0x189   :  { %v142_v21 = vpop.xlane.xlu0 %141 }
 0x18a   :  { %v144_v22 = vmul.f32 0.03125, %v142_v21  ;;  %v147_v23 = vmul.f32 %v3552_v10, %v145_v20 }
 0x18c   :  { %v146_v24 = vsub.f32 %v132_v14, %v144_v22  ;;  %v149_v25 = vmul.f32 %v147_v23, %v147_v23 }
 0x18e   :  { %151 = vadd.xlane.f32.xlu1 %v149_v25  ;;  %v148_v26 = vmul.f32 %v3552_v10, %v146_v24 }
 0x190   :  { %v150_v27 = vmul.f32 %v148_v26, %v148_v26 }
 0x192   :  { %153 = vadd.xlane.f32.xlu1 %v150_v27  ;;  %v2243_v27 = vld [vmem:[%s4249_s9] ss:$0 sm:$0xff] }
 0x21b   :  { %v152_v38 = vpop.xlane.xlu1 %151 }
 0x21c   :  { %v155_v39 = vmul.f32 0.03125, %v152_v38  ;;  %v2252_v38 = vld [vmem:[%s4251_s11 + $0x80] sm:$0xff] }
 0x21e   :  { %v157_v40 = vadd.f32 1e-05, %v155_v39  ;;  %v3649_v39 = vpack.c.bf16 %v456_v37, %v455_v36 }
 0x21f   :  { %v154_v41 = vpop.xlane.xlu1 %153 }
 0x220   :  { %3390 = vrsqrt.f32 %v157_v40  ;;  %v156_v42 = vmul.f32 0.03125, %v154_v41  ;;  %v2253_v40 = vld [vmem:[%s4251_s11 + $0x88] sm:$0xff]  ;;  %v457_v41 = vld [vmem:[%s4251_s11 + $0x10] sm:$0xff]  ;;  %3048 = vmatprep.subr.bf16.mxu1 %v3649_v39 }
 0x222   :  { %v158_v43 = vadd.f32 1e-05, %v156_v42  ;;  %v458_v42 = vld [vmem:[%s4251_s11 + $0x18] sm:$0xff] }
 0x224   :  { %3392 = vrsqrt.f32 %v158_v43  ;;  %v3660_v43 = vpack.c.bf16 %v2253_v40, %v2252_v38 }
 0x226   :  { %3080 = vmatprep.subr.bf16.mxu0 %v3660_v43 }
 0x22a   :  { %v3391_v44 = vpop.eup %3390 }
 0x22b   :  { %v161_v46 = vmul.f32 %v3391_v44, %v147_v23  ;;  %v3662_v44 = vpack.c.bf16 %v458_v42, %v457_v41 }
 0x22d   :  { %v169_v48 = vmul.f32 %v2228_v45, %v161_v46  ;;  %v2255_v46 = vld [vmem:[%s4251_s11 + $0x98] sm:$0xff] }
 0x22e   :  { %v3393_v49 = vpop.eup %3392 }
 0x22f   :  { %v162_v50 = vmul.f32 %v3393_v49, %v148_v26  ;;  %v177_v51 = vadd.f32 %v2229_v47, %v169_v48  ;;  %v460_v49 = vld [vmem:[%s4251_s11 + $0x28] sm:$0xff] }
 0x231   :  { %v170_v52 = vmul.f32 %v2228_v45, %v162_v50  ;;  %v181_v53 = vmin.f32 %v177_v51, 0.0  ;;  %vm179_vm4 = vcmp.gt.f32.partialorder %v177_v51, 0.0  ;;  %v2254_v45 = vld [vmem:[%s4251_s11 + $0x90] sm:$0xff]  ;;  %v2256_v50 = vld [vmem:[%s4251_s11 + $0xa0] sm:$0xff] }
 0x232   :  { %v3674_v48 = vpack.c.bf16 %v2255_v46, %v2254_v45 }
 0x233   :  { %v178_v54 = vadd.f32 %v2229_v47, %v170_v52  ;;  %v183_v55 = vmul.f32 1.442695, %v181_v53  ;;  %v459_v47 = vld [vmem:[%s4251_s11 + $0x20] sm:$0xff] }
 0x234   :  { %v3689_v52 = vpack.c.bf16 %v460_v49, %v459_v47  ;;  %v3805_v47 = vld [vmem:[%s4250_s10 + $0x10] sm:$0xff]  ;;  %v2282_v49 = vld [vmem:[%s4252_s12 + $0x80] sm:$0xff] }
 0x235   :  { %v182_v56 = vmin.f32 %v178_v54, 0.0  ;;  %3394 = vpow2.f32 %v183_v55  ;;  %vm180_vm5 = vcmp.gt.f32.partialorder %v178_v54, 0.0  ;;  %v462_v55 = vld [vmem:[%s4251_s11 + $0x38] sm:$0xff] }
 0x237   :  { %v185_v57 = vmul.f32 1.442695, %v182_v56  ;;  %v2258_v56 = vld [vmem:[%s4251_s11 + $0xb0] sm:$0xff] }
 0x239   :  { %3396 = vpow2.f32 %v185_v57  ;;  %v2259_v57 = vld [vmem:[%s4251_s11 + $0xb8] sm:$0xff] }
 0x23f   :  { %v3395_v58 = vpop.eup %3394 }
 0x240   :  { %v2230_v59 = vadd.f32 -1.0, %v3395_v58 }
 0x242   :  { %v3603_v62 = vsel %vm179_vm4, %v177_v51, %v2230_v59  ;;  %v2257_v51 = vld [vmem:[%s4251_s11 + $0xa8] sm:$0xff]  ;;  %v3712_v59 = vpack.c.bf16 %v2259_v57, %v2258_v56  ;;  %v2286_v57 = vld [vmem:[%s4252_s12 + $0xa0] sm:$0xff] }
 0x243   :  { %v3397_v60 = vpop.eup %3396  ;;  %v3692_v53 = vpack.c.bf16 %v2257_v51, %v2256_v50  ;;  %v2283_v50 = vld [vmem:[%s4252_s12 + $0x88] sm:$0xff]  ;;  %v2284_v51 = vld [vmem:[%s4252_s12 + $0x90] sm:$0xff] }
 0x244   :  { %v2231_v61 = vadd.f32 -1.0, %v3397_v60 }
 0x246   :  { %v3605_v63 = vsel %vm180_vm5, %v178_v54, %v2231_v61  ;;  %v461_v54 = vld [vmem:[%s4251_s11 + $0x30] sm:$0xff] }
 0x247   :  { %v191_v0 = vpack.c.bf16 %v3605_v63, %v3603_v62  ;;  %v3709_v58 = vpack.c.bf16 %v462_v55, %v461_v54  ;;  %v3818_v54 = vpack.c.bf16 %v2283_v50, %v2282_v49  ;;  %v2285_v55 = vld [vmem:[%s4252_s12 + $0x98] sm:$0xff]  ;;  %v3370_v50 = vld [vmem:[%s4246_s6 + $0x60] sm:$0xff]  }
 0x248   :  { %v3823_v56 = vpack.c.bf16 %v2285_v55, %v2284_v51  ;;  %v3369_v49 = vld [vmem:[%s4246_s6 + $0x58] sm:$0xff]   ;;  %v3371_v51 = vld [vmem:[%s4246_s6 + $0x68] sm:$0xff]  }
 0x249   :  { %2622 = vmatmul.mubr.bf16.vlgmr.msra.gmra.mrb[0].mxu1 %v191_v0 }
 0x24a   :  { %3050 = vmatpush3.bf16.msra.mxu1 %v3649_v39 }
 0x24b   :  { %3052 = vmatprep.subr.bf16.mxu1 %v3662_v44 }
 0x24e   :  { %3054 = vmatpush3.bf16.msra.mxu1 %v3662_v44 }
 0x24f   :  { %3056 = vmatprep.subr.bf16.mxu1 %v3689_v52 }
 0x252   :  { %3058 = vmatpush3.bf16.msra.mxu1 %v3689_v52 }
 0x253   :  { %3060 = vmatprep.subr.bf16.mxu1 %v3709_v58 }
 0x256   :  { %3062 = vmatpush3.bf16.msra.mxu1 %v3709_v58 }
 0x31c   :  { %v297_v9 = vpop.f32.mrb[0].mxu1 }
 0x31d   :  { %v298_v11 = vadd.f32 %v2232_v8, %v297_v9  ;;  %v2623_v12 = vpop.f32.mrb[1].mxu1  ;;  %v463_v9 = vld [vmem:[%s4251_s11 + $0x40] sm:$0xff] }
 0x31e   :  { %v300_v13 = vpop.f32.mrb[2].mxu1  ;;  %v2260_v12 = vld [vmem:[%s4251_s11 + $0xc0] sm:$0xff] }
 0x31f   :  { %v306_v14 = vmin.f32 %v298_v11, 0.0  ;;  %v301_v15 = vadd.f32 %v2232_v8, %v300_v13  ;;  %v2624_v16 = vpop.f32.mrb[3].mxu1  ;;  %vm304_vm6 = vcmp.gt.f32.partialorder %v298_v11, 0.0 }
 0x320   :  { %v465_v16 = vld [vmem:[%s4251_s11 + $0x50] sm:$0xff] }
 0x321   :  { %v308_v17 = vmul.f32 1.442695, %v306_v14  ;;  %v307_v18 = vmin.f32 %v301_v15, 0.0  ;;  %vm305_vm7 = vcmp.gt.f32.partialorder %v301_v15, 0.0  ;;  %v2261_v14 = vld [vmem:[%s4251_s11 + $0xc8] sm:$0xff] }
 0x323   :  { %3398 = vpow2.f32 %v308_v17  ;;  %v310_v19 = vmul.f32 1.442695, %v307_v18  ;;  %v466_v17 = vld [vmem:[%s4251_s11 + $0x58] sm:$0xff]  ;;  %v2262_v18 = vld [vmem:[%s4251_s11 + $0xd0] sm:$0xff] }
 0x325   :  { %3400 = vpow2.f32 %v310_v19  ;;  %v3751_v19 = vpack.c.bf16 %v466_v17, %v465_v16  ;;  %v3862_v16 = vld [vmem:[%s4250_s10 + $0x18] sm:$0xff]  ;;  %v3867_v17 = vld [vmem:[%s4250_s10] sm:$0xff] }
 0x32d   :  { %v3399_v20 = vpop.eup %3398 }
 0x32e   :  { %v2241_v21 = vadd.f32 -1.0, %v3399_v20  ;;  %v2263_v20 = vld [vmem:[%s4251_s11 + $0xd8] sm:$0xff] }
 0x32f   :  { %v3401_v22 = vpop.eup %3400 }
 0x330   :  { %v2242_v23 = vadd.f32 -1.0, %v3401_v22  ;;  %v314_v24 = vsel %vm304_vm6, %v298_v11, %v2241_v21  ;;  %v464_v11 = vld [vmem:[%s4251_s11 + $0x48] sm:$0xff]  ;;  %v3756_v21 = vpack.c.bf16 %v2263_v20, %v2262_v18  ;;  %v467_v22 = vld [vmem:[%s4251_s11 + $0x60] sm:$0xff]  ;;  %v3881_v20 = vld [vmem:[%s4250_s10 + $0x30] sm:$0xff] }
 0x331   :  { %v3731_v13 = vpack.c.bf16 %v464_v11, %v463_v9  ;;  %v3876_v18 = vld [vmem:[%s4250_s10 + $0x8] sm:$0xff] }
 0x332   :  { %v315_v25 = vsel %vm305_vm7, %v301_v15, %v2242_v23  ;;  %v3736_v15 = vpack.c.bf16 %v2261_v14, %v2260_v12  ;;  %v468_v23 = vld [vmem:[%s4251_s11 + $0x68] sm:$0xff] }
 0x333   :  { %v316_v26 = vpack.c.bf16 %v315_v25, %v314_v24  ;;  %3064 = vmatprep.subr.bf16.mxu1 %v3731_v13  ;;  %v2264_v24 = vld [vmem:[%s4251_s11 + $0xe0] sm:$0xff]  ;;  %v3768_v25 = vpack.c.bf16 %v468_v23, %v467_v22  ;;  %v3890_v22 = vld [vmem:[%s4250_s10 + $0x38] sm:$0xff] }
 0x334   :  { %3066 = vmatpush3.bf16.msra.mxu1 %v3731_v13  ;;  %v3895_v23 = vld [vmem:[%s4250_s10 + $0x20] sm:$0xff] }
 0x335   :  { %2642 = vmatmul.mubr.bf16.vlgmr.msra.gmra.mrb[4].mxu0 %v316_v26  ;;  %3068 = vmatprep.subr.bf16.mxu1 %v3751_v19  ;;  %v2265_v26 = vld [vmem:[%s4251_s11 + $0xe8] sm:$0xff] }
 0x336   :  { %3082 = vmatpush3.bf16.msra.mxu0 %v3660_v43 }
 0x337   :  { %3084 = vmatprep.subr.bf16.mxu0 %v3674_v48 }
 0x338   :  { %3070 = vmatpush3.bf16.msra.mxu1 %v3751_v19 }
 0x339   :  { %3072 = vmatprep.subr.bf16.mxu1 %v3768_v25 }
 0x33a   :  { %3086 = vmatpush3.bf16.msra.mxu0 %v3674_v48 }
 0x33b   :  { %3088 = vmatprep.subr.bf16.mxu0 %v3692_v53 }
 0x33c   :  { %3074 = vmatpush3.bf16.msra.mxu1 %v3768_v25 }
 0x33e   :  { %3090 = vmatpush3.bf16.msra.mxu0 %v3692_v53 }
 0x33f   :  { %3092 = vmatprep.subr.bf16.mxu0 %v3712_v59 }
 0x342   :  { %3094 = vmatpush3.bf16.msra.mxu0 %v3712_v59 }
 0x343   :  { %3096 = vmatprep.subr.bf16.mxu0 %v3736_v15 }
 0x346   :  { %3098 = vmatpush3.bf16.msra.mxu0 %v3736_v15 }
 0x347   :  { %3100 = vmatprep.subr.bf16.mxu0 %v3756_v21 }
 0x34a   :  { %3102 = vmatpush3.bf16.msra.mxu0 %v3756_v21 }
 0x408   :  { %v422_v28 = vpop.f32.mrb[4].mxu0 }
 0x409   :  { %v423_v29 = vadd.f32 %v2243_v27, %v422_v28  ;;  %v2643_v30 = vpop.f32.mrb[5].mxu0  ;;  %v470_v28 = vld [vmem:[%s4251_s11 + $0x78] sm:$0xff] }
 0x40a   :  { %v425_v31 = vpop.f32.mrb[6].mxu0  ;;  %v2266_v30 = vld [vmem:[%s4251_s11 + $0xf0] sm:$0xff] }
 0x40b   :  { %v426_v32 = vadd.f32 %v2243_v27, %v425_v31  ;;  %v2644_v33 = vpop.f32.mrb[7].mxu0  ;;  %v429_v34 = vmul.f32 %v3552_v10, %v423_v29  ;;  %v469_v27 = vld [vmem:[%s4251_s11 + $0x70] sm:$0xff]  ;;  %v2267_v31 = vld [vmem:[%s4251_s11 + $0xf8] sm:$0xff] }
 0x40c   :  { %v3794_v33 = vpack.c.bf16 %v2267_v31, %v2266_v30  ;;  %v2294_v30 = vld [vmem:[%s4252_s12 + $0xe0] sm:$0xff]  ;;  %v2295_v31 = vld [vmem:[%s4252_s12 + $0xe8] sm:$0xff] }
 0x40d   :  { %431 = vadd.xlane.f32.xlu0 %v429_v34  ;;  %v430_v35 = vmul.f32 %v3552_v10, %v426_v32 }
 0x40f   :  { %433 = vadd.xlane.f32.xlu1 %v430_v35 }
 0x49a   :  { %v432_v60 = vpop.xlane.xlu0 %431 }
 0x49b   :  { %v435_v61 = vmul.f32 0.03125, %v432_v60  ;;  %v2287_v60 = vld [vmem:[%s4252_s12 + $0xa8] sm:$0xff] }
 0x49c   :  { %v434_v0 = vpop.xlane.xlu1 %433 }
 0x49d   :  { %v437_v2 = vsub.f32 %v423_v29, %v435_v61  ;;  %v436_v3 = vmul.f32 0.03125, %v434_v0  ;;  %v3781_v29 = vpack.c.bf16 %v2265_v26, %v2264_v24  ;;  %v3834_v61 = vpack.c.bf16 %v2287_v60, %v2286_v57  ;;  %v2288_v0 = vld [vmem:[%s4252_s12 + $0xb0] sm:$0xff]  ;;  %v3905_v24 = vld [vmem:[%s4250_s10 + $0x28] sm:$0xff]  ;;  %s2360_s10 = sld [smem:[#allocation2 + $0x1]] }
 0x49e   :  { %v2292_v26 = vld [vmem:[%s4252_s12 + $0xd0] sm:$0xff] }
 0x49f   :  { %v438_v4 = vsub.f32 %v426_v32, %v436_v3  ;;  %v439_v5 = vmul.f32 %v3552_v10, %v437_v2  ;;  %v3791_v32 = vpack.c.bf16 %v470_v28, %v469_v27  ;;  %3104 = vmatprep.subr.bf16.mxu0 %v3781_v29  ;;  %v2289_v2 = vld [vmem:[%s4252_s12 + $0xb8] sm:$0xff]  ;;  %v808_v60 = vld [vmem:[%s4252_s12 + $0x10] sm:$0xff] }
 0x4a0   :  { %3106 = vmatpush3.bf16.msra.mxu0 %v3781_v29  ;;  %v3844_v3 = vpack.c.bf16 %v2289_v2, %v2288_v0  ;;  %v2293_v27 = vld [vmem:[%s4252_s12 + $0xd8] sm:$0xff] }
 0x4a1   :  { %v441_v6 = vmul.f32 %v439_v5, %v439_v5  ;;  %v440_v7 = vmul.f32 %v3552_v10, %v438_v4  ;;  %3076 = vmatprep.subr.bf16.mxu1 %v3791_v32  ;;  %3108 = vmatprep.subr.bf16.mxu0 %v3794_v33  ;;  %v2290_v4 = vld [vmem:[%s4252_s12 + $0xc0] sm:$0xff]  ;;  %v3917_v28 = vpack.c.bf16 %v2293_v27, %v2292_v26  ;;  %v809_v0 = vld [vmem:[%s4252_s12 + $0x18] sm:$0xff]  ;;  %v815_v27 = vld [vmem:[%s4252_s12 + $0x48] sm:$0xff] }
 0x4a2   :  { %3078 = vmatpush3.bf16.msra.mxu1 %v3791_v32  ;;  %v814_v26 = vld [vmem:[%s4252_s12 + $0x40] sm:$0xff] }
 0x4a3   :  { %443 = vadd.xlane.f32.xlu0 %v441_v6  ;;  %v442_v8 = vmul.f32 %v440_v7, %v440_v7  ;;  %3128 = vmatprep.subr.bf16.mxu1 %v3818_v54 }
 0x4a4   :  { %3110 = vmatpush3.bf16.msra.mxu0 %v3794_v33 }
 0x4a5   :  { %445 = vadd.xlane.f32.xlu1 %v442_v8 }
 0x530   :  { %v444_v34 = vpop.xlane.xlu0 %443 }
 0x531   :  { %v447_v35 = vmul.f32 0.03125, %v444_v34  ;;  %v3925_v34 = vpack.c.bf16 %v2295_v31, %v2294_v30  ;;  %v4010_v30 = vpack.c.bf16 %v815_v27, %v814_v26  ;;  %v816_v31 = vld [vmem:[%s4252_s12 + $0x50] sm:$0xff] }
 0x532   :  { %v446_v36 = vpop.xlane.xlu1 %445 }
 0x533   :  { %v449_v37 = vadd.f32 1e-05, %v447_v35  ;;  %v448_v38 = vmul.f32 0.03125, %v446_v36  ;;  %v2296_v35 = vld [vmem:[%s4252_s12 + $0xf0] sm:$0xff]  ;;  %v2297_v36 = vld [vmem:[%s4252_s12 + $0xf8] sm:$0xff] }
 0x535   :  { %3402 = vrsqrt.f32 %v449_v37  ;;  %v450_v40 = vadd.f32 1e-05, %v448_v38  ;;  %v3936_v37 = vpack.c.bf16 %v2297_v36, %v2296_v35  ;;  %v806_v38 = vld [vmem:[%s4252_s12] sm:$0xff]  ;;  %v817_v35 = vld [vmem:[%s4252_s12 + $0x58] sm:$0xff] }
 0x536   :  { %v4020_v36 = vpack.c.bf16 %v817_v35, %v816_v31 }
 0x537   :  { %3404 = vrsqrt.f32 %v450_v40  ;;  %v807_v40 = vld [vmem:[%s4252_s12 + $0x8] sm:$0xff] }
 0x53f   :  { %v3403_v41 = vpop.eup %3402 }
 0x540   :  { %v453_v42 = vmul.f32 %v3403_v41, %v439_v5  ;;  %v2291_v5 = vld [vmem:[%s4252_s12 + $0xc8] sm:$0xff]  ;;  %v3947_v41 = vpack.c.bf16 %v807_v40, %v806_v38  ;;  %v818_v38 = vld [vmem:[%s4252_s12 + $0x60] sm:$0xff] }
 0x541   :  { %v3405_v45 = vpop.eup %3404  ;;  %v3854_v6 = vpack.c.bf16 %v2291_v5, %v2290_v4  ;;  %v3980_v5 = vpack.c.bf16 %v809_v0, %v808_v60  ;;  %v819_v40 = vld [vmem:[%s4252_s12 + $0x68] sm:$0xff]  ;;  %v3378_v60 = vld [vmem:[%s4248_s8 + $0x60] sm:$0xff]  }
 0x542   :  { %2677 = vmatprep.mubr.f32.mxu1 %v453_v42  ;;  %2712 = vmatprep.mubr.f32.mxu0 %v453_v42  ;;  %v454_v46 = vmul.f32 %v3405_v45, %v440_v7  ;;  %v3366_v42 = vld [vmem:[%s4246_s6 + $0x40] sm:$0xff]   ;;  %v3367_v45 = vld [vmem:[%s4246_s6 + $0x48] sm:$0xff]  }
 0x543   :  { %v3379_v0 = vld [vmem:[%s4248_s8 + $0x68] sm:$0xff]  }
 0x544   :  { %2678 = vmatmul.mubr.f32.vlgmr.msra.gmra.mrb[4].mxu1 %v454_v46  ;;  %2713 = vmatmul.mubr.f32.vlgmr.msra.gmra.mrb[8].mxu0 %v454_v46  ;;  %v3368_v46 = vld [vmem:[%s4246_s6 + $0x50] sm:$0xff]  }
 0x545   :  { %2719 = vmatprep.mubr.msk.f32.mxu0 %vm643_vm8, %v3805_v47  ;;  %3130 = vmatpush3.bf16.msra.mxu1 %v3818_v54 }
 0x546   :  { %3132 = vmatprep.subr.bf16.mxu1 %v3823_v56 }
 0x549   :  { %3134 = vmatpush3.bf16.msra.mxu1 %v3823_v56 }
 0x54a   :  { %3136 = vmatprep.subr.bf16.mxu1 %v3834_v61 }
 0x54d   :  { %3138 = vmatpush3.bf16.msra.mxu1 %v3834_v61 }
 0x54e   :  { %3140 = vmatprep.subr.bf16.mxu1 %v3844_v3 }
 0x551   :  { %3142 = vmatpush3.bf16.msra.mxu1 %v3844_v3 }
 0x552   :  { %3144 = vmatprep.subr.bf16.mxu1 %v3854_v6 }
 0x555   :  { %3146 = vmatpush3.bf16.msra.mxu1 %v3854_v6 }
 0x556   :  { %3148 = vmatprep.subr.bf16.mxu1 %v3917_v28 }
 0x559   :  { %3150 = vmatpush3.bf16.msra.mxu1 %v3917_v28 }
 0x55a   :  { %3152 = vmatprep.subr.bf16.mxu1 %v3925_v34 }
 0x55d   :  { %3154 = vmatpush3.bf16.msra.mxu1 %v3925_v34 }
 0x55e   :  { %3156 = vmatprep.subr.bf16.mxu1 %v3936_v37 }
 0x561   :  { %3158 = vmatpush3.bf16.msra.mxu1 %v3936_v37 }
 0x562   :  { %3160 = vmatprep.subr.bf16.mxu1 %v3947_v41 }
 0x617   :  { %v2679_v7 = vpop.f32.mrb[4].mxu1  ;;  %v2714_v8 = vpop.f32.mrb[8].mxu0 }
 0x618   :  { %v537_v9 = vpop.f32.mrb[5].mxu1  ;;  %v629_v11 = vpop.f32.mrb[9].mxu0 }
 0x619   :  { %v3115_v12 = vpack.c.bf16 %v2679_v7, %v537_v9  ;;  %v3111_v14 = vpack.c.bf16 %v2714_v8, %v629_v11  ;;  %v810_v7 = vld [vmem:[%s4252_s12 + $0x20] sm:$0xff]  ;;  %v811_v8 = vld [vmem:[%s4252_s12 + $0x28] sm:$0xff]  ;;  %v812_v11 = vld [vmem:[%s4252_s12 + $0x30] sm:$0xff] }
 0x61a   :  { %v3990_v9 = vpack.c.bf16 %v811_v8, %v810_v7  ;;  %v2315_v7 = vld [vmem:[%s4247_s7 + $0x1] ss:$0 sm:$0xff] }
 0x61b   :  { %3112 = vmatprep.subr.bf16.mxu0 %v3111_v14 }
 0x61c   :  { %3114 = vmatpush3.bf16.msra.mxu0 %v3111_v14 }
 0x61d   :  { %3116 = vmatprep.subr.bf16.mxu0 %v3115_v12 }
 0x61f   :  { %2720 = vmatmul.mubr.msk.f32.vlgmr.msra.gmra.mrb[10].mxu0 %vm643_vm8, %v3862_v16 }
 0x620   :  { %3118 = vmatpush3.bf16.msra.mxu0 %v3115_v12  ;;  %2726 = vmatprep.mubr.msk.f32.mxu0 %vm643_vm8, %v3867_v17 }
 0x621   :  { %3120 = vmatprep.subr.bf16.mxu0 %v3111_v14 }
 0x627   :  { %2727 = vmatmul.mubr.msk.f32.vlgmr.msra.gmra.mrb[10].mxu0 %vm643_vm8, %v3876_v18 }
 0x628   :  { %3122 = vmatpush3.bf16.msra.mxu0 %v3111_v14  ;;  %2733 = vmatprep.mubr.msk.f32.mxu0 %vm643_vm8, %v3881_v20 }
 0x629   :  { %3124 = vmatprep.subr.bf16.mxu0 %v3115_v12 }
 0x62b   :  { %2734 = vmatmul.mubr.msk.f32.vlgmr.msra.gmra.mrb[12].mxu0 %vm643_vm8, %v3890_v22 }
 0x62c   :  { %3126 = vmatpush3.bf16.msra.mxu0 %v3115_v12  ;;  %2740 = vmatprep.mubr.msk.f32.mxu0 %vm643_vm8, %v3895_v23  ;;  %v813_v12 = vld [vmem:[%s4252_s12 + $0x38] sm:$0xff] }
 0x62d   :  { %2813 = vmatprep.subr.bf16.mxu0 %v3433_v1  ;;  %v4000_v14 = vpack.c.bf16 %v813_v12, %v812_v11 }
 0x633   :  { %2741 = vmatmul.mubr.msk.f32.vlgmr.msra.gmra.mrb[12].mxu0 %vm643_vm8, %v3905_v24 }
 0x634   :  { %2829 = vmatprep.mubr.msk.bf16.mxu0 %vm3434_vm1, %v3433_v1  ;;  %2814 = vmatpush3.bf16.msra.mxu0 %v3366_v42  ;;  %v4030_v42 = vpack.c.bf16 %v819_v40, %v818_v38 }
 0x635   :  { %2815 = vmatprep.subr.bf16.mxu0 %v3433_v1 }
 0x638   :  { %2816 = vmatpush3.bf16.msra.mxu0 %v3367_v45  ;;  %v820_v45 = vld [vmem:[%s4252_s12 + $0x70] sm:$0xff] }
 0x639   :  { %2817 = vmatprep.subr.bf16.mxu0 %v3433_v1 }
 0x63c   :  { %2818 = vmatpush3.bf16.msra.mxu0 %v3368_v46  ;;  %v821_v46 = vld [vmem:[%s4252_s12 + $0x78] sm:$0xff] }
 0x63d   :  { %2819 = vmatprep.subr.bf16.mxu0 %v3433_v1 }
 0x640   :  { %2820 = vmatpush3.bf16.msra.mxu0 %v3369_v49  ;;  %v4040_v49 = vpack.c.bf16 %v821_v46, %v820_v45 }
 0x641   :  { %2821 = vmatprep.subr.bf16.mxu0 %v3433_v1 }
 0x644   :  { %2822 = vmatpush3.bf16.msra.mxu0 %v3370_v50 }
 0x645   :  { %2823 = vmatprep.subr.bf16.mxu0 %v3433_v1 }
 0x648   :  { %2824 = vmatpush3.bf16.msra.mxu0 %v3371_v51  ;;  %v3374_v51 = vld [vmem:[%s4248_s8 + $0x40] sm:$0xff]  }
 0x649   :  { %2825 = vmatprep.subr.bf16.mxu0 %v3433_v1 }
 0x6fa   :  { %v2728_v55 = vpop.f32.mrb[10].mxu0 }
 0x6fb   :  { %v797_v57 = vpop.f32.mrb[11].mxu0 }
 0x706   :  { %v2742_v2 = vpop.f32.mrb[12].mxu0 }
 0x707   :  { %v981_v4 = vpop.f32.mrb[13].mxu0 }
 0x708   :  { %2775 = vmatprep.mubr.f32.mxu1 %v981_v4  ;;  %v3381_v4 = vld [vmem:[%s4248_s8 + $0x78] sm:$0xff]  }
 0x709   :  { %2776 = vmatmul.mubr.f32.vlgmr.msra.gmra.mrb[6].mxu1 %v2742_v2  ;;  %v3380_v2 = vld [vmem:[%s4248_s8 + $0x70] sm:$0xff]  }
 0x70a   :  { %3162 = vmatpush3.bf16.msra.mxu1 %v3947_v41  ;;  %2810 = vmatprep.mubr.f32.mxu1 %v797_v57  ;;  %v3375_v57 = vld [vmem:[%s4248_s8 + $0x48] sm:$0xff]  }
 0x70b   :  { %3164 = vmatprep.subr.bf16.mxu1 %v3980_v5 }
 0x70e   :  { %3166 = vmatpush3.bf16.msra.mxu1 %v3980_v5 }
 0x70f   :  { %3168 = vmatprep.subr.bf16.mxu1 %v3990_v9 }
 0x712   :  { %3170 = vmatpush3.bf16.msra.mxu1 %v3990_v9 }
 0x713   :  { %3172 = vmatprep.subr.bf16.mxu1 %v4000_v14 }
 0x716   :  { %3174 = vmatpush3.bf16.msra.mxu1 %v4000_v14 }
 0x717   :  { %3176 = vmatprep.subr.bf16.mxu1 %v4010_v30 }
 0x71a   :  { %3178 = vmatpush3.bf16.msra.mxu1 %v4010_v30 }
 0x71b   :  { %3180 = vmatprep.subr.bf16.mxu1 %v4020_v36 }
 0x71e   :  { %3182 = vmatpush3.bf16.msra.mxu1 %v4020_v36 }
 0x71f   :  { %3184 = vmatprep.subr.bf16.mxu1 %v4030_v42 }
 0x722   :  { %3186 = vmatpush3.bf16.msra.mxu1 %v4030_v42 }
 0x723   :  { %3188 = vmatprep.subr.bf16.mxu1 %v4040_v49 }
 0x726   :  { %3190 = vmatpush3.bf16.msra.mxu1 %v4040_v49 }
 0x727   :  { %3192 = vmatprep.subr.bf16.mxu1 %v3649_v39 }
 0x729   :  { %2811 = vmatmul.mubr.f32.vlgmr.msra.gmra.mrb[6].mxu1 %v2728_v55 }
 0x72a   :  { %3194 = vmatpush3.bf16.msra.mxu1 %v3649_v39  ;;  %v3372_v39 = vld [vmem:[%s4246_s6 + $0x70] sm:$0xff]  }
 0x72b   :  { %3196 = vmatprep.subr.bf16.mxu1 %v3662_v44  ;;  %2826 = vmatpush3.bf16.msra.mxu0 %v3372_v39 }
 0x72c   :  { %2827 = vmatprep.subr.bf16.mxu0 %v3433_v1 }
 0x72e   :  { %3198 = vmatpush3.bf16.msra.mxu1 %v3662_v44  ;;  %v3373_v44 = vld [vmem:[%s4246_s6 + $0x78] sm:$0xff]  }
 0x72f   :  { %3200 = vmatprep.subr.bf16.mxu1 %v3689_v52  ;;  %2828 = vmatpush3.bf16.msra.mxu0 %v3373_v44 }
 0x730   :  { %2833 = vmatprep.subr.bf16.mxu0 %v3433_v1 }
 0x732   :  { %3202 = vmatpush3.bf16.msra.mxu1 %v3689_v52  ;;  %v1158_v52 = vstv %s1157_s25 }
 0x733   :  { %3204 = vmatprep.subr.bf16.mxu1 %v3709_v58 }
 0x736   :  { %3206 = vmatpush3.bf16.msra.mxu1 %v3709_v58 }
 0x737   :  { %3208 = vmatprep.subr.bf16.mxu1 %v3731_v13 }
 0x73a   :  { %3210 = vmatpush3.bf16.msra.mxu1 %v3731_v13 }
 0x73b   :  { %3212 = vmatprep.subr.bf16.mxu1 %v3751_v19 }
 0x73e   :  { %3214 = vmatpush3.bf16.msra.mxu1 %v3751_v19 }
 0x73f   :  { %3216 = vmatprep.subr.bf16.mxu1 %v3768_v25 }
 0x742   :  { %3218 = vmatpush3.bf16.msra.mxu1 %v3768_v25 }
 0x743   :  { %3220 = vmatprep.subr.bf16.mxu1 %v3791_v32 }
 0x746   :  { %3222 = vmatpush3.bf16.msra.mxu1 %v3791_v32 }
 0x7fc   :  { %v2812_v58 = vpop.f32.mrb[6].mxu1 }
 0x7fd   :  { %v1160_v13 = vmul.f32 %v2812_v58, %v1158_v52  ;;  %v1148_v19 = vpop.f32.mrb[7].mxu1 }
 0x7fe   :  { %v1159_v25 = vmul.f32 %v1158_v52, %v1148_v19 }
 0x7ff   :  { %v4070_v32 = vsub.f32 %v3605_v63, %v1160_v13  ;;  %v3377_v63 = vld [vmem:[%s4248_s8 + $0x58] sm:$0xff]  }
 0x800   :  { %v4073_v50 = vsub.f32 %v3603_v62, %v1159_v25  ;;  %v3376_v62 = vld [vmem:[%s4248_s8 + $0x50] sm:$0xff]  }
 0x802   :  { %v1163_v55 = vpack.c.bf16 %v4070_v32, %v4073_v50 }
 0x804   :  { %2830 = vmatmul.mubr.bf16.vlgmr.msra.gmra.mrb[16].mxu0 %v1163_v55 }
 0x805   :  { %2834 = vmatpush3.bf16.msra.mxu0 %v3374_v51  ;;  %2849 = vmatprep.mubr.msk.bf16.mxu0 %vm3434_vm1, %v3433_v1 }
 0x806   :  { %2835 = vmatprep.subr.bf16.mxu0 %v3433_v1 }
 0x809   :  { %2836 = vmatpush3.bf16.msra.mxu0 %v3375_v57 }
 0x80a   :  { %2837 = vmatprep.subr.bf16.mxu0 %v3433_v1 }
 0x80d   :  { %2838 = vmatpush3.bf16.msra.mxu0 %v3376_v62 }
 0x80e   :  { %2839 = vmatprep.subr.bf16.mxu0 %v3433_v1 }
 0x811   :  { %2840 = vmatpush3.bf16.msra.mxu0 %v3377_v63 }
 0x812   :  { %2841 = vmatprep.subr.bf16.mxu0 %v3433_v1 }
 0x815   :  { %2842 = vmatpush3.bf16.msra.mxu0 %v3378_v60 }
 0x816   :  { %2843 = vmatprep.subr.bf16.mxu0 %v3433_v1 }
 0x819   :  { %2844 = vmatpush3.bf16.msra.mxu0 %v3379_v0 }
 0x81a   :  { %2845 = vmatprep.subr.bf16.mxu0 %v3433_v1 }
 0x81d   :  { %2846 = vmatpush3.bf16.msra.mxu0 %v3380_v2 }
 0x81e   :  { %2847 = vmatprep.subr.bf16.mxu0 %v3433_v1 }
 0x821   :  { %2848 = vmatpush3.bf16.msra.mxu0 %v3381_v4 }
 0x822   :  { %3224 = vmatprep.subr.bf16.mxu0 %v3660_v43 }
 0x8d7   :  { %v1271_v8 = vpop.f32.mrb[16].mxu0 }
 0x8d8   :  { %v1272_v11 = vadd.f32 %v2315_v7, %v1271_v8  ;;  %v2831_v12 = vpop.f32.mrb[17].mxu0 }
 0x8d9   :  { %v1274_v26 = vpop.f32.mrb[18].mxu0 }
 0x8da   :  { %v1280_v27 = vmin.f32 %v1272_v11, 0.0  ;;  %v1275_v31 = vadd.f32 %v2315_v7, %v1274_v26  ;;  %v2832_v35 = vpop.f32.mrb[19].mxu0  ;;  %vm1278_vm9 = vcmp.gt.f32.partialorder %v1272_v11, 0.0 }
 0x8dc   :  { %v1282_v38 = vmul.f32 1.442695, %v1280_v27  ;;  %v1281_v40 = vmin.f32 %v1275_v31, 0.0  ;;  %vm1279_vm10 = vcmp.gt.f32.partialorder %v1275_v31, 0.0 }
 0x8de   :  { %3406 = vpow2.f32 %v1282_v38  ;;  %v1284_v45 = vmul.f32 1.442695, %v1281_v40 }
 0x8e0   :  { %3408 = vpow2.f32 %v1284_v45 }
 0x8e8   :  { %v3407_v46 = vpop.eup %3406 }
 0x8e9   :  { %v2324_v39 = vadd.f32 -1.0, %v3407_v46 }
 0x8ea   :  { %v3409_v44 = vpop.eup %3408 }
 0x8eb   :  { %v2325_v52 = vadd.f32 -1.0, %v3409_v44  ;;  %v1288_v58 = vsel %vm1278_vm9, %v1272_v11, %v2324_v39 }
 0x8ed   :  { %v1289_v13 = vsel %vm1279_vm10, %v1275_v31, %v2325_v52 }
 0x8ee   :  { %v1290_v19 = vpack.c.bf16 %v1289_v13, %v1288_v58 }
 0x8f0   :  { %2850 = vmatmul.mubr.bf16.vlgmr.msra.gmra.mrb[20].mxu0 %v1290_v19 }
 0x8f1   :  { %3226 = vmatpush3.bf16.msra.mxu0 %v3660_v43  ;;  %v2343_v43 = vld [vmem:[%s4249_s9 + $0x1] ss:$0 sm:$0xff] }
 0x8f2   :  { %3228 = vmatprep.subr.bf16.mxu0 %v3674_v48 }
 0x8f5   :  { %3230 = vmatpush3.bf16.msra.mxu0 %v3674_v48 }
 0x8f6   :  { %3232 = vmatprep.subr.bf16.mxu0 %v3692_v53 }
 0x8f9   :  { %3234 = vmatpush3.bf16.msra.mxu0 %v3692_v53 }
 0x8fa   :  { %3236 = vmatprep.subr.bf16.mxu0 %v3712_v59 }
 0x8fd   :  { %3238 = vmatpush3.bf16.msra.mxu0 %v3712_v59 }
 0x8fe   :  { %3240 = vmatprep.subr.bf16.mxu0 %v3736_v15 }
 0x901   :  { %3242 = vmatpush3.bf16.msra.mxu0 %v3736_v15 }
 0x902   :  { %3244 = vmatprep.subr.bf16.mxu0 %v3756_v21 }
 0x905   :  { %3246 = vmatpush3.bf16.msra.mxu0 %v3756_v21 }
 0x906   :  { %3248 = vmatprep.subr.bf16.mxu0 %v3781_v29 }
 0x909   :  { %3250 = vmatpush3.bf16.msra.mxu0 %v3781_v29 }
 0x90a   :  { %3252 = vmatprep.subr.bf16.mxu0 %v3794_v33 }
 0x90d   :  { %3254 = vmatpush3.bf16.msra.mxu0 %v3794_v33 }
 0x9c3   :  { %v1398_v48 = vpop.f32.mrb[20].mxu0 }
 0x9c4   :  { %v1399_v53 = vadd.f32 %v2343_v43, %v1398_v48  ;;  %v2851_v59 = vpop.f32.mrb[21].mxu0 }
 0x9c5   :  { %v1401_v15 = vpop.f32.mrb[22].mxu0 }
 0x9c6   :  { %v1402_v25 = vadd.f32 %v2343_v43, %v1401_v15  ;;  %v2852_v51 = vpop.f32.mrb[23].mxu0  ;;  %v1405_v21 = vmul.f32 %v3552_v10, %v1399_v53 }
 0x9c8   :  { %1407 = vadd.xlane.f32.xlu0 %v1405_v21  ;;  %v1406_v55 = vmul.f32 %v3552_v10, %v1402_v25 }
 0x9ca   :  { %1409 = vadd.xlane.f32.xlu1 %v1406_v55 }
 0xa55   :  { %v1408_v29 = vpop.xlane.xlu0 %1407 }
 0xa56   :  { %v1411_v57 = vmul.f32 0.03125, %v1408_v29 }
 0xa57   :  { %v1410_v62 = vpop.xlane.xlu1 %1409 }
 0xa58   :  { %v1413_v33 = vsub.f32 %v1399_v53, %v1411_v57  ;;  %v1412_v63 = vmul.f32 0.03125, %v1410_v62  ;;  %v2372_v62 = vld [vmem:[%s4256_s16] ss:$0 sm:$0xff] }
 0xa5a   :  { %v1414_v60 = vsub.f32 %v1402_v25, %v1412_v63  ;;  %v1415_v0 = vmul.f32 %v3552_v10, %v1413_v33 }
 0xa5c   :  { %v1417_v2 = vmul.f32 %v1415_v0, %v1415_v0  ;;  %v1416_v4 = vmul.f32 %v3552_v10, %v1414_v60 }
 0xa5e   :  { %1419 = vadd.xlane.f32.xlu0 %v1417_v2  ;;  %v1418_v7 = vmul.f32 %v1416_v4, %v1416_v4 }
 0xa60   :  { %1421 = vadd.xlane.f32.xlu1 %v1418_v7 }
 0xaeb   :  { %v1420_v8 = vpop.xlane.xlu0 %1419 }
 0xaec   :  { %v1423_v11 = vmul.f32 0.03125, %v1420_v8 }
 0xaed   :  { %v1422_v12 = vpop.xlane.xlu1 %1421 }
 0xaee   :  { %v1425_v26 = vadd.f32 1e-05, %v1423_v11  ;;  %v1424_v27 = vmul.f32 0.03125, %v1422_v12 }
 0xaf0   :  { %3410 = vrsqrt.f32 %v1425_v26  ;;  %v1426_v31 = vadd.f32 1e-05, %v1424_v27 }
 0xaf2   :  { %3412 = vrsqrt.f32 %v1426_v31 }
 0xafa   :  { %v3411_v35 = vpop.eup %3410 }
 0xafb   :  { %v1429_v38 = vmul.f32 %v3411_v35, %v1415_v0 }
 0xafc   :  { %v3413_v40 = vpop.eup %3412 }
 0xafd   :  { %2885 = vmatprep.mubr.f32.mxu1 %v1429_v38  ;;  %2920 = vmatprep.mubr.f32.mxu0 %v1429_v38  ;;  %v1430_v45 = vmul.f32 %v3413_v40, %v1416_v4 }
 0xaff   :  { %2886 = vmatmul.mubr.f32.vlgmr.msra.gmra.mrb[8].mxu1 %v1430_v45  ;;  %2921 = vmatmul.mubr.f32.vlgmr.msra.gmra.mrb[14].mxu0 %v1430_v45 }
 0xb00   :  { %2941 = vmatprep.mubr.msk.f32.mxu0 %vm643_vm8, %v3881_v20  ;;  %2927 = vmatprep.mubr.msk.f32.mxu1 %vm643_vm8, %v3805_v47  ;;  %v3382_v47 = vld [vmem:[%s4253_s13] sm:$0xff]  }
 0xbd2   :  { %v2887_v10 = vpop.f32.mrb[8].mxu1  ;;  %v2922_v46 = vpop.f32.mrb[14].mxu0 }
 0xbd3   :  { %v1497_v39 = vpop.f32.mrb[9].mxu1  ;;  %v1572_v44 = vpop.f32.mrb[15].mxu0 }
 0xbd4   :  { %v3259_v52 = vpack.c.bf16 %v2887_v10, %v1497_v39  ;;  %v3255_v58 = vpack.c.bf16 %v2922_v46, %v1572_v44 }
 0xbd6   :  { %3256 = vmatprep.subr.bf16.mxu1 %v3255_v58  ;;  %3264 = vmatprep.subr.bf16.mxu0 %v3255_v58 }
 0xbd7   :  { %3258 = vmatpush3.bf16.msra.mxu1 %v3255_v58  ;;  %3266 = vmatpush3.bf16.msra.mxu0 %v3255_v58 }
 0xbd8   :  { %3260 = vmatprep.subr.bf16.mxu1 %v3259_v52  ;;  %3268 = vmatprep.subr.bf16.mxu0 %v3259_v52 }
 0xbda   :  { %2942 = vmatmul.mubr.msk.f32.vlgmr.msra.gmra.mrb[24].mxu0 %vm643_vm8, %v3890_v22  ;;  %2928 = vmatmul.mubr.msk.f32.vlgmr.msra.gmra.mrb[10].mxu1 %vm643_vm8, %v3862_v16  ;;  %v3388_v22 = vld [vmem:[%s4253_s13 + $0x30] sm:$0xff]  }
 0xbdb   :  { %3262 = vmatpush3.bf16.msra.mxu1 %v3259_v52  ;;  %3270 = vmatpush3.bf16.msra.mxu0 %v3259_v52 }
 0xbdc   :  { %2948 = vmatprep.mubr.msk.f32.mxu0 %vm643_vm8, %v3895_v23  ;;  %2934 = vmatprep.mubr.msk.f32.mxu1 %vm643_vm8, %v3867_v17  ;;  %v3389_v23 = vld [vmem:[%s4253_s13 + $0x38] sm:$0xff]  }
 0xbdd   :  { %3272 = vmatprep.subr.bf16.mxu1 %v3818_v54  ;;  %3021 = vmatprep.subr.bf16.mxu0 %v3433_v1 }
 0xbe2   :  { %2949 = vmatmul.mubr.msk.f32.vlgmr.msra.gmra.mrb[24].mxu0 %vm643_vm8, %v3905_v24  ;;  %2935 = vmatmul.mubr.msk.f32.vlgmr.msra.gmra.mrb[10].mxu1 %vm643_vm8, %v3876_v18  ;;  %v2032_v24 = vstv %s2360_s10 }
 0xbe3   :  { %3274 = vmatpush3.bf16.msra.mxu1 %v3818_v54  ;;  %3037 = vmatprep.mubr.msk.bf16.mxu0 %vm3434_vm1, %v3433_v1  ;;  %v3383_v54 = vld [vmem:[%s4253_s13 + $0x8] sm:$0xff]  }
 0xbe4   :  { %3276 = vmatprep.subr.bf16.mxu1 %v3823_v56  ;;  %3022 = vmatpush3.bf16.msra.mxu0 %v3382_v47 }
 0xbe5   :  { %3023 = vmatprep.subr.bf16.mxu0 %v3433_v1 }
 0xbe7   :  { %3278 = vmatpush3.bf16.msra.mxu1 %v3823_v56  ;;  %v3384_v56 = vld [vmem:[%s4253_s13 + $0x10] sm:$0xff]  }
 0xbe8   :  { %3280 = vmatprep.subr.bf16.mxu1 %v3834_v61  ;;  %3024 = vmatpush3.bf16.msra.mxu0 %v3383_v54 }
 0xbe9   :  { %3025 = vmatprep.subr.bf16.mxu0 %v3433_v1 }
 0xbeb   :  { %3282 = vmatpush3.bf16.msra.mxu1 %v3834_v61  ;;  %v3385_v61 = vld [vmem:[%s4253_s13 + $0x18] sm:$0xff]  }
 0xbec   :  { %3284 = vmatprep.subr.bf16.mxu1 %v3844_v3  ;;  %3026 = vmatpush3.bf16.msra.mxu0 %v3384_v56 }
 0xbed   :  { %3027 = vmatprep.subr.bf16.mxu0 %v3433_v1 }
 0xbef   :  { %3286 = vmatpush3.bf16.msra.mxu1 %v3844_v3  ;;  %v3386_v3 = vld [vmem:[%s4253_s13 + $0x20] sm:$0xff]  }
 0xbf0   :  { %3288 = vmatprep.subr.bf16.mxu1 %v3854_v6  ;;  %3028 = vmatpush3.bf16.msra.mxu0 %v3385_v61 }
 0xbf1   :  { %3029 = vmatprep.subr.bf16.mxu0 %v3433_v1 }
 0xbf3   :  { %3290 = vmatpush3.bf16.msra.mxu1 %v3854_v6  ;;  %v3387_v6 = vld [vmem:[%s4253_s13 + $0x28] sm:$0xff]  }
 0xbf4   :  { %3292 = vmatprep.subr.bf16.mxu1 %v3917_v28  ;;  %3030 = vmatpush3.bf16.msra.mxu0 %v3386_v3 }
 0xbf5   :  { %3031 = vmatprep.subr.bf16.mxu0 %v3433_v1 }
 0xbf7   :  { %3294 = vmatpush3.bf16.msra.mxu1 %v3917_v28 }
 0xbf8   :  { %3296 = vmatprep.subr.bf16.mxu1 %v3925_v34  ;;  %3032 = vmatpush3.bf16.msra.mxu0 %v3387_v6 }
 0xbf9   :  { %3033 = vmatprep.subr.bf16.mxu0 %v3433_v1 }
 0xbfb   :  { %3298 = vmatpush3.bf16.msra.mxu1 %v3925_v34 }
 0xbfc   :  { %3300 = vmatprep.subr.bf16.mxu1 %v3936_v37  ;;  %3034 = vmatpush3.bf16.msra.mxu0 %v3388_v22 }
 0xbfd   :  { %3035 = vmatprep.subr.bf16.mxu0 %v3433_v1 }
 0xbff   :  { %3302 = vmatpush3.bf16.msra.mxu1 %v3936_v37 }
 0xc00   :  { %3304 = vmatprep.subr.bf16.mxu1 %v3947_v41  ;;  %3036 = vmatpush3.bf16.msra.mxu0 %v3389_v23 }
 0xc01   :  { %3041 = vmatprep.subr.bf16.mxu0 %v3433_v1 }
 0xcb5   :  { %v2950_v16 = vpop.f32.mrb[24].mxu0  ;;  %v2936_v17 = vpop.f32.mrb[10].mxu1 }
 0xcb6   :  { %v1872_v18 = vpop.f32.mrb[25].mxu0  ;;  %v1722_v20 = vpop.f32.mrb[11].mxu1 }
 0xcb7   :  { %2983 = vmatprep.mubr.f32.mxu1 %v1872_v18 }
 0xcb8   :  { %2984 = vmatmul.mubr.f32.vlgmr.msra.gmra.mrb[12].mxu1 %v2950_v16 }
 0xcb9   :  { %3306 = vmatpush3.bf16.msra.mxu1 %v3947_v41  ;;  %3018 = vmatprep.mubr.f32.mxu1 %v1722_v20 }
 0xcba   :  { %3308 = vmatprep.subr.bf16.mxu1 %v3980_v5 }
 0xcbd   :  { %3310 = vmatpush3.bf16.msra.mxu1 %v3980_v5  ;;  %v2163_v5 = vld [vmem:[%s4255_s15] sm:$0xf] }
 0xcbe   :  { %3312 = vmatprep.subr.bf16.mxu1 %v3990_v9 }
 0xcc1   :  { %3314 = vmatpush3.bf16.msra.mxu1 %v3990_v9 }
 0xcc2   :  { %3316 = vmatprep.subr.bf16.mxu1 %v4000_v14 }
 0xcc5   :  { %3318 = vmatpush3.bf16.msra.mxu1 %v4000_v14 }
 0xcc6   :  { %3320 = vmatprep.subr.bf16.mxu1 %v4010_v30 }
 0xcc9   :  { %3322 = vmatpush3.bf16.msra.mxu1 %v4010_v30  ;;  %v2175_v30 = vsel %vm90_vm0, %v2163_v5, 0 }
 0xcca   :  { %3324 = vmatprep.subr.bf16.mxu1 %v4020_v36 }
 0xccd   :  { %3326 = vmatpush3.bf16.msra.mxu1 %v4020_v36 }
 0xcce   :  { %3328 = vmatprep.subr.bf16.mxu1 %v4030_v42 }
 0xcd1   :  { %3330 = vmatpush3.bf16.msra.mxu1 %v4030_v42  ;;  %v2361_v42 = vld [vmem:[%s4254_s14] ss:$0 sm:$0xff] }
 0xcd2   :  { %3332 = vmatprep.subr.bf16.mxu1 %v4040_v49 }
 0xcd5   :  { %3334 = vmatpush3.bf16.msra.mxu1 %v4040_v49 }
 0xcd8   :  { %3019 = vmatmul.mubr.f32.vlgmr.msra.gmra.mrb[12].mxu1 %v2936_v17 }
 0xdab   :  { %v3020_v28 = vpop.f32.mrb[12].mxu1 }
 0xdac   :  { %v2034_v34 = vmul.f32 %v3020_v28, %v2032_v24  ;;  %v2022_v37 = vpop.f32.mrb[13].mxu1 }
 0xdad   :  { %v2033_v41 = vmul.f32 %v2032_v24, %v2022_v37 }
 0xdae   :  { %v2036_v9 = vsub.f32 %v4070_v32, %v2034_v34 }
 0xdaf   :  { %v2035_v14 = vsub.f32 %v4073_v50, %v2033_v41 }
 0xdb1   :  { %v2037_v36 = vpack.c.bf16 %v2036_v9, %v2035_v14 }
 0xdb3   :  { %3038 = vmatmul.mubr.bf16.vlgmr.msra.gmra.mrb[28].mxu0 %v2037_v36 }
 0xdb4   :  { %3042 = vmatpush3.bf16.msra.mxu0 %v2175_v30  ;;  %3043 = vmatprep.mubr.msk.bf16.mxu0 %vm3434_vm1, %v3433_v1 }
 0xe86   :  { %v2143_v49 = vpop.f32.mrb[28].mxu0 }
 0xe87   :  { %v2144_v13 = vadd.f32 %v2361_v42, %v2143_v49  ;;  %v3039_v19 = vpop.f32.mrb[29].mxu0 }
 0xe88   :  { %v2146_v43 = vpop.f32.mrb[30].mxu0 }
 0xe89   :  { %v2152_v48 = vmin.f32 %v2144_v13, 0.0  ;;  %v2147_v32 = vadd.f32 %v2361_v42, %v2146_v43  ;;  %v3040_v53 = vpop.f32.mrb[31].mxu0  ;;  %vm2150_vm11 = vcmp.gt.f32.partialorder %v2144_v13, 0.0 }
 0xe8b   :  { %v2154_v50 = vmul.f32 1.442695, %v2152_v48  ;;  %v2153_v59 = vmin.f32 %v2147_v32, 0.0  ;;  %vm2151_vm12 = vcmp.gt.f32.partialorder %v2147_v32, 0.0 }
 0xe8d   :  { %3414 = vpow2.f32 %v2154_v50  ;;  %v2156_v15 = vmul.f32 1.442695, %v2153_v59 }
 0xe8f   :  { %3416 = vpow2.f32 %v2156_v15 }
 0xe97   :  { %v3415_v25 = vpop.eup %3414 }
 0xe98   :  { %v2370_v51 = vadd.f32 -1.0, %v3415_v25 }
 0xe99   :  { %v3417_v21 = vpop.eup %3416 }
 0xe9a   :  { %v2371_v1 = vadd.f32 -1.0, %v3417_v21  ;;  %v2160_v55 = vsel %vm2150_vm11, %v2144_v13, %v2370_v51 }
 0xe9c   :  { %v2161_v29 = vsel %vm2151_vm12, %v2147_v32, %v2371_v1 }
 0xe9d   :  { %v2162_v57 = vpack.c.bf16 %v2161_v29, %v2160_v55 }
 0xe9f   :  { %3044 = vmatmul.mubr.msk.bf16.vlgmr.msra.gmra.mrb[32].mxu0 %vm86_vm2, %v2162_v57 }
 0xf72   :  { %v2211_v33 = vpop.f32.mrb[32].mxu0 }
 0xf73   :  { %v2212_v63 = vadd.f32 %v2372_v62, %v2211_v33  ;;  %v3045_v60 = vpop.f32.mrb[33].mxu0 }
 0xf74   :  { %v2214_v0 = vpop.f32.mrb[34].mxu0 }
 0xf75   :  { %2218 = vst [vmem:[%s4257_s17] sm:$0xff] %v2212_v63  ;;  %v2215_v2 = vadd.f32 %v2372_v62, %v2214_v0  ;;  %v3046_v4 = vpop.f32.mrb[35].mxu0 }
 0xf77   :  { %2219 = vst [vmem:[%s4257_s17 + $0x8] sm:$0xff] %v2215_v2 }
 0xf78   :  { %2224 = vsyncpa [#allocation3], 1 }

</bundles_post_ra>
